<compile_context>
chip_gen: v5e
topology: v5e:2x2
jax: 0.10.0
libtpu: 0.0.40
codegen_flags: <defaults>
</compile_context>

<pallas_src>
import math
import functools

import jax
import jax.numpy as jnp
from jax.experimental import pallas as pl
from jax.experimental.pallas import tpu as pltpu

_HALF_LOG_2PI = 0.5 * math.log(2.0 * math.pi)


def _bc_loss_kernel(obs_ref, act_ref, mask_ref,
                    w1_ref, b1_ref, w2_ref, b2_ref,
                    inv_std_ref, nll_const_ref,
                    out_ref, acc_ref, *, inv_batch):
    """Grid = (core_split, row_tiles). Accumulates per-core masked NLL."""
    k = pl.program_id(1)

    @pl.when(k == 0)
    def _():
        acc_ref[...] = jnp.zeros_like(acc_ref)

    # ---- actor MLP: two MXU matmuls with resident weights, f32 accumulate ----
    h = jnp.tanh(
        jnp.dot(obs_ref[...], w1_ref[...], preferred_element_type=jnp.float32)
        + b1_ref[...]
    )
    mu = (
        jnp.dot(h, w2_ref[...], preferred_element_type=jnp.float32)
        + b2_ref[...]
    )

    # ---- per-element Normal NLL (row-sum & scalar reduce deferred) ----
    #   -log N(a; mu, std) per element = 0.5*z^2 + log_std + 0.5*log(2*pi)
    # inv_std and (log_std + 0.5*log(2*pi)) are precomputed in the wrapper.
    z = (act_ref[...].astype(jnp.float32) - mu) * inv_std_ref[...]   # [tm, A]
    nll_elem = 0.5 * (z * z) + nll_const_ref[...]                    # [tm, A]
    acc_ref[...] += nll_elem * mask_ref[...]                         # mask bcast over A

    # ---- epilogue: full reduce + 1/B scale, once per outer (core) block ----
    @pl.when(k == pl.num_programs(1) - 1)
    def _():
        total = jnp.sum(acc_ref[...]) * inv_batch
        out_ref[...] = jnp.full(out_ref.shape, total, dtype=out_ref.dtype)


def bc_loss(obs, act, mask, w1, b1, w2, b2, log_std, *,
            batch_size, tm=512, n_split=2, use_bf16=False):
    """obs [M,D], act [M,A], mask [M,1] -> scalar loss."""
    M, D = obs.shape
    A = act.shape[-1]
    H = w1.shape[-1]

    # Loop-invariant hoists (tiny (1,A) ops, done once instead of per grid step).
    log_std = log_std.astype(jnp.float32)
    inv_std = jnp.exp(-log_std)                    # [1, A]
    nll_const = log_std + _HALF_LOG_2PI            # [1, A]

    # Pad rows so M is a multiple of n_split*tm; padded rows carry mask=0.
    rows_per_chunk = n_split * tm
    M_pad = rows_per_chunk * pl.cdiv(M, rows_per_chunk)
    if M_pad != M:
        pad = M_pad - M
        obs = jnp.pad(obs, ((0, pad), (0, 0)))
        act = jnp.pad(act, ((0, pad), (0, 0)))
        mask = jnp.pad(mask, ((0, pad), (0, 0)))
    inner_steps = M_pad // rows_per_chunk

    if use_bf16:
        # Halves HBM traffic for the dominant streams; accumulation stays f32.
        obs = obs.astype(jnp.bfloat16)
        act = act.astype(jnp.bfloat16)
        w1 = w1.astype(jnp.bfloat16)

    kernel = functools.partial(_bc_loss_kernel,
                               inv_batch=1.0 / float(batch_size))

    row_map = lambda i, k: (i * inner_steps + k, 0)
    const_map = lambda i, k: (0, 0)

    out = pl.pallas_call(
        kernel,
        out_shape=jax.ShapeDtypeStruct((n_split * 8, 128), jnp.float32),
        grid_spec=pltpu.PrefetchScalarGridSpec(
            num_scalar_prefetch=0,
            grid=(n_split, inner_steps),
            in_specs=[
                pl.BlockSpec((tm, D), row_map),     # obs tile (streamed)
                pl.BlockSpec((tm, A), row_map),     # action tile (streamed)
                pl.BlockSpec((tm, 1), row_map),     # mask tile (streamed)
                pl.BlockSpec((D, H), const_map),    # W1 (resident)
                pl.BlockSpec((1, H), const_map),    # b1
                pl.BlockSpec((H, A), const_map),    # W2
                pl.BlockSpec((1, A), const_map),    # b2
                pl.BlockSpec((1, A), const_map),    # exp(-log_std)
                pl.BlockSpec((1, A), const_map),    # log_std + 0.5*log(2*pi)
            ],
            out_specs=pl.BlockSpec((8, 128), lambda i, k: (i, 0)),  # per-core partial
            scratch_shapes=[pltpu.VMEM((tm, A), jnp.float32)],      # NLL accumulator
        ),
        compiler_params=pltpu.CompilerParams(
            dimension_semantics=("parallel", "arbitrary"),
        ),
    )(obs, act, mask, w1, b1, w2, b2, inv_std, nll_const)

    # Every element of each (8,128) block holds that core's partial; sum them.
    partials = out.reshape(n_split, 8, 128)[:, 0, 0]
    return jnp.sum(partials)


def _reference_loss(obs, act, mask, w1, b1, w2, b2, log_std, batch_size):
    h = jnp.tanh(obs @ w1 + b1)
    mu = h @ w2 + b2
    inv_std = jnp.exp(-log_std)
    z = (act - mu) * inv_std
    lp = jnp.sum(-0.5 * z * z - log_std - _HALF_LOG_2PI, axis=-1, keepdims=True)
    return jnp.sum(-lp * mask) / batch_size


if __name__ == "__main__":
    # Small shapes consistent with the module: batch of trajectories with a
    # per-timestep mask, Gaussian actor over continuous actions.
    B, T, D, H, A = 2, 8, 32, 32, 8
    M = B * T

    key = jax.random.PRNGKey(0)
    k_obs, k_act, k_mask, k_w1, k_w2, k_ls = jax.random.split(key, 6)

    obs = jax.random.normal(k_obs, (M, D), dtype=jnp.float32)
    act = jax.random.normal(k_act, (M, A), dtype=jnp.float32)
    mask = (jax.random.uniform(k_mask, (M, 1)) < 0.8).astype(jnp.float32)

    w1 = jax.random.normal(k_w1, (D, H), dtype=jnp.float32) * (1.0 / math.sqrt(D))
    b1 = jnp.zeros((1, H), dtype=jnp.float32)
    w2 = jax.random.normal(k_w2, (H, A), dtype=jnp.float32) * (1.0 / math.sqrt(H))
    b2 = jnp.zeros((1, A), dtype=jnp.float32)
    log_std = 0.1 * jax.random.normal(k_ls, (1, A), dtype=jnp.float32)

    ref = _reference_loss(obs, act, mask, w1, b1, w2, b2, log_std, B)

    # f32 path (exact match expected).
    loss = bc_loss(obs, act, mask, w1, b1, w2, b2, log_std,
                   batch_size=B, tm=512, n_split=2)
    loss = jax.block_until_ready(loss)
    assert jnp.allclose(loss, ref, rtol=1e-5, atol=1e-5), (loss, ref)

    # bf16-input path (halves HBM traffic on v6e/v7x); looser tolerance.
    loss_bf16 = bc_loss(obs, act, mask, w1, b1, w2, b2, log_std,
                        batch_size=B, tm=512, n_split=2, use_bf16=True)
    loss_bf16 = jax.block_until_ready(loss_bf16)
    assert jnp.allclose(loss_bf16, ref, rtol=1e-1), (loss_bf16, ref)

    print("KERNEL_OK")
</pallas_src>

<mosaic_0001>
module attributes {stable_mosaic.version = 11 : i64} {
  func.func @_bc_loss_kernel(%arg0: i32, %arg1: i32, %arg2: memref<512x32xf32, #tpu.memory_space<vmem>>, %arg3: memref<512x8xf32, #tpu.memory_space<vmem>>, %arg4: memref<512x1xf32, #tpu.memory_space<vmem>>, %arg5: memref<32x32xf32, #tpu.memory_space<vmem>>, %arg6: memref<1x32xf32, #tpu.memory_space<vmem>>, %arg7: memref<32x8xf32, #tpu.memory_space<vmem>>, %arg8: memref<1x8xf32, #tpu.memory_space<vmem>>, %arg9: memref<1x8xf32, #tpu.memory_space<vmem>>, %arg10: memref<1x8xf32, #tpu.memory_space<vmem>>, %arg11: memref<8x128xf32, #tpu.memory_space<vmem>>, %arg12: memref<512x8xf32, #tpu.memory_space<vmem>>) attributes {dimension_semantics = [#tpu.dimension_semantics<parallel>, #tpu.dimension_semantics<arbitrary>], iteration_bounds = array<i64: 2, 1>, scalar_prefetch = 0 : i64, scratch_operands = 1 : i64, tpu.core_type = #tpu.core_type<tc>, window_params = [{transform_indices = @transform_0, window_bounds = array<i64: 512, 32>}, {transform_indices = @transform_1, window_bounds = array<i64: 512, 8>}, {transform_indices = @transform_2, window_bounds = array<i64: 512, 1>}, {pipeline_mode = #tpu.pipeline_mode<synchronous>, transform_indices = @transform_3, window_bounds = array<i64: 32, 32>}, {pipeline_mode = #tpu.pipeline_mode<synchronous>, transform_indices = @transform_4, window_bounds = array<i64: 1, 32>}, {pipeline_mode = #tpu.pipeline_mode<synchronous>, transform_indices = @transform_5, window_bounds = array<i64: 32, 8>}, {pipeline_mode = #tpu.pipeline_mode<synchronous>, transform_indices = @transform_6, window_bounds = array<i64: 1, 8>}, {pipeline_mode = #tpu.pipeline_mode<synchronous>, transform_indices = @transform_7, window_bounds = array<i64: 1, 8>}, {pipeline_mode = #tpu.pipeline_mode<synchronous>, transform_indices = @transform_8, window_bounds = array<i64: 1, 8>}, {transform_indices = @transform_9, window_bounds = array<i64: 8, 128>}]} {
    %c0_i32 = arith.constant 0 : i32
    %0 = arith.cmpi eq, %arg1, %c0_i32 : i32
    %1 = arith.extui %0 : i1 to i32
    %c0_i32_0 = arith.constant 0 : i32
    %2 = arith.cmpi ne, %1, %c0_i32_0 : i32
    scf.if %2 {
      %cst_26 = arith.constant 0.000000e+00 : f32
      %35 = vector.broadcast %cst_26 : f32 to vector<512x8xf32>
      %c0_27 = arith.constant 0 : index
      %c0_28 = arith.constant 0 : index
      %36 = vector.load %arg12[%c0_27, %c0_28] : memref<512x8xf32, #tpu.memory_space<vmem>>, vector<512x8xf32>
      tpu.vector_store %arg12[%c0_27, %c0_28], %35 {strides = array<i32>} : memref<512x8xf32, #tpu.memory_space<vmem>>, vector<512x8xf32>,
    } else {
    }
    %c0 = arith.constant 0 : index
    %c0_1 = arith.constant 0 : index
    %3 = vector.load %arg2[%c0, %c0_1] : memref<512x32xf32, #tpu.memory_space<vmem>>, vector<512x32xf32>
    %c0_2 = arith.constant 0 : index
    %c0_3 = arith.constant 0 : index
    %4 = vector.load %arg5[%c0_2, %c0_3] : memref<32x32xf32, #tpu.memory_space<vmem>>, vector<32x32xf32>
    %cst = arith.constant dense<0.000000e+00> : vector<512x32xf32>
    %5 = tpu.matmul %3, %4, %cst {dimension_numbers = #tpu.dot_dimension_numbers<[1], [0], [0], [1], [0, 0, 1, 1], [], []>} : vector<512x32xf32>, vector<32x32xf32>, vector<512x32xf32> -> vector<512x32xf32>
    %c0_4 = arith.constant 0 : index
    %c0_5 = arith.constant 0 : index
    %6 = vector.load %arg6[%c0_4, %c0_5] : memref<1x32xf32, #tpu.memory_space<vmem>>, vector<1x32xf32>
    %7 = vector.broadcast %6 : vector<1x32xf32> to vector<512x32xf32>
    %8 = arith.addf %5, %7 : vector<512x32xf32>
    %9 = math.tanh %8 : vector<512x32xf32>
    %c0_6 = arith.constant 0 : index
    %c0_7 = arith.constant 0 : index
    %10 = vector.load %arg7[%c0_6, %c0_7] : memref<32x8xf32, #tpu.memory_space<vmem>>, vector<32x8xf32>
    %cst_8 = arith.constant dense<0.000000e+00> : vector<512x8xf32>
    %11 = tpu.matmul %9, %10, %cst_8 {dimension_numbers = #tpu.dot_dimension_numbers<[1], [0], [0], [1], [0, 0, 1, 1], [], []>} : vector<512x32xf32>, vector<32x8xf32>, vector<512x8xf32> -> vector<512x8xf32>
    %c0_9 = arith.constant 0 : index
    %c0_10 = arith.constant 0 : index
    %12 = vector.load %arg8[%c0_9, %c0_10] : memref<1x8xf32, #tpu.memory_space<vmem>>, vector<1x8xf32>
    %13 = vector.broadcast %12 : vector<1x8xf32> to vector<512x8xf32>
    %14 = arith.addf %11, %13 : vector<512x8xf32>
    %c0_11 = arith.constant 0 : index
    %c0_12 = arith.constant 0 : index
    %15 = vector.load %arg3[%c0_11, %c0_12] : memref<512x8xf32, #tpu.memory_space<vmem>>, vector<512x8xf32>
    %16 = arith.subf %15, %14 : vector<512x8xf32>
    %c0_13 = arith.constant 0 : index
    %c0_14 = arith.constant 0 : index
    %17 = vector.load %arg9[%c0_13, %c0_14] : memref<1x8xf32, #tpu.memory_space<vmem>>, vector<1x8xf32>
    %18 = vector.broadcast %17 : vector<1x8xf32> to vector<512x8xf32>
    %19 = arith.mulf %16, %18 : vector<512x8xf32>
    %20 = arith.mulf %19, %19 : vector<512x8xf32>
    %cst_15 = arith.constant 5.000000e-01 : f32
    %21 = vector.broadcast %cst_15 : f32 to vector<512x8xf32>
    %22 = arith.mulf %21, %20 : vector<512x8xf32>
    %c0_16 = arith.constant 0 : index
    %c0_17 = arith.constant 0 : index
    %23 = vector.load %arg10[%c0_16, %c0_17] : memref<1x8xf32, #tpu.memory_space<vmem>>, vector<1x8xf32>
    %24 = vector.broadcast %23 : vector<1x8xf32> to vector<512x8xf32>
    %25 = arith.addf %22, %24 : vector<512x8xf32>
    %c0_18 = arith.constant 0 : index
    %c0_19 = arith.constant 0 : index
    %26 = vector.load %arg12[%c0_18, %c0_19] : memref<512x8xf32, #tpu.memory_space<vmem>>, vector<512x8xf32>
    %c0_20 = arith.constant 0 : index
    %c0_21 = arith.constant 0 : index
    %27 = vector.load %arg4[%c0_20, %c0_21] : memref<512x1xf32, #tpu.memory_space<vmem>>, vector<512x1xf32>
    %28 = vector.broadcast %27 : vector<512x1xf32> to vector<512x8xf32>
    %29 = arith.mulf %25, %28 : vector<512x8xf32>
    %30 = arith.addf %26, %29 : vector<512x8xf32>
    %c0_22 = arith.constant 0 : index
    %c0_23 = arith.constant 0 : index
    %31 = vector.load %arg12[%c0_22, %c0_23] : memref<512x8xf32, #tpu.memory_space<vmem>>, vector<512x8xf32>
    tpu.vector_store %arg12[%c0_22, %c0_23], %30 {strides = array<i32>} : memref<512x8xf32, #tpu.memory_space<vmem>>, vector<512x8xf32>,
    %c0_i32_24 = arith.constant 0 : i32
    %32 = arith.cmpi eq, %arg1, %c0_i32_24 : i32
    %33 = arith.extui %32 : i1 to i32
    %c0_i32_25 = arith.constant 0 : i32
    %34 = arith.cmpi ne, %33, %c0_i32_25 : i32
    scf.if %34 {
      %c0_26 = arith.constant 0 : index
      %c0_27 = arith.constant 0 : index
      %35 = vector.load %arg12[%c0_26, %c0_27] : memref<512x8xf32, #tpu.memory_space<vmem>>, vector<512x8xf32>
      %36 = vector.shape_cast %35 : vector<512x8xf32> to vector<1x512x8xf32>
      %cst_28 = arith.constant dense<0.000000e+00> : vector<1xf32>
      %37 = vector.multi_reduction <add>, %36, %cst_28 [1, 2] : vector<1x512x8xf32> to vector<1xf32>
      %38 = vector.shape_cast %37 : vector<1xf32> to vector<1x1x1xf32>
      %39 = vector.extract %38[0, 0, 0] : f32 from vector<1x1x1xf32>
      %cst_29 = arith.constant 5.000000e-01 : f32
      %40 = arith.mulf %39, %cst_29 : f32
      %41 = vector.broadcast %40 : f32 to vector<8x128xf32>
      %c0_30 = arith.constant 0 : index
      %c0_31 = arith.constant 0 : index
      %42 = vector.load %arg11[%c0_30, %c0_31] : memref<8x128xf32, #tpu.memory_space<vmem>>, vector<8x128xf32>
      tpu.vector_store %arg11[%c0_30, %c0_31], %41 {strides = array<i32>} : memref<8x128xf32, #tpu.memory_space<vmem>>, vector<8x128xf32>,
    } else {
    }
    return
  }
  func.func @transform_0(%arg0: i32, %arg1: i32) -> (i32, i32) {
    %c1_i32 = arith.constant 1 : i32
    %0 = arith.muli %arg0, %c1_i32 : i32
    %1 = arith.addi %0, %arg1 : i32
    %c0_i32 = arith.constant 0 : i32
    %c0_i32_0 = arith.constant 0 : i32
    return %1, %c0_i32 : i32, i32
  }
  func.func @transform_1(%arg0: i32, %arg1: i32) -> (i32, i32) {
    %c1_i32 = arith.constant 1 : i32
    %0 = arith.muli %arg0, %c1_i32 : i32
    %1 = arith.addi %0, %arg1 : i32
    %c0_i32 = arith.constant 0 : i32
    %c0_i32_0 = arith.constant 0 : i32
    return %1, %c0_i32 : i32, i32
  }
  func.func @transform_2(%arg0: i32, %arg1: i32) -> (i32, i32) {
    %c1_i32 = arith.constant 1 : i32
    %0 = arith.muli %arg0, %c1_i32 : i32
    %1 = arith.addi %0, %arg1 : i32
    %c0_i32 = arith.constant 0 : i32
    %c0_i32_0 = arith.constant 0 : i32
    return %1, %c0_i32 : i32, i32
  }
  func.func @transform_3(%arg0: i32, %arg1: i32) -> (i32, i32) {
    %c0_i32 = arith.constant 0 : i32
    %c0_i32_0 = arith.constant 0 : i32
    %c0_i32_1 = arith.constant 0 : i32
    return %c0_i32, %c0_i32_0 : i32, i32
  }
  func.func @transform_4(%arg0: i32, %arg1: i32) -> (i32, i32) {
    %c0_i32 = arith.constant 0 : i32
    %c0_i32_0 = arith.constant 0 : i32
    %c0_i32_1 = arith.constant 0 : i32
    return %c0_i32, %c0_i32_0 : i32, i32
  }
  func.func @transform_5(%arg0: i32, %arg1: i32) -> (i32, i32) {
    %c0_i32 = arith.constant 0 : i32
    %c0_i32_0 = arith.constant 0 : i32
    %c0_i32_1 = arith.constant 0 : i32
    return %c0_i32, %c0_i32_0 : i32, i32
  }
  func.func @transform_6(%arg0: i32, %arg1: i32) -> (i32, i32) {
    %c0_i32 = arith.constant 0 : i32
    %c0_i32_0 = arith.constant 0 : i32
    %c0_i32_1 = arith.constant 0 : i32
    return %c0_i32, %c0_i32_0 : i32, i32
  }
  func.func @transform_7(%arg0: i32, %arg1: i32) -> (i32, i32) {
    %c0_i32 = arith.constant 0 : i32
    %c0_i32_0 = arith.constant 0 : i32
    %c0_i32_1 = arith.constant 0 : i32
    return %c0_i32, %c0_i32_0 : i32, i32
  }
  func.func @transform_8(%arg0: i32, %arg1: i32) -> (i32, i32) {
    %c0_i32 = arith.constant 0 : i32
    %c0_i32_0 = arith.constant 0 : i32
    %c0_i32_1 = arith.constant 0 : i32
    return %c0_i32, %c0_i32_0 : i32, i32
  }
  func.func @transform_9(%arg0: i32, %arg1: i32) -> (i32, i32) {
    %c0_i32 = arith.constant 0 : i32
    %c0_i32_0 = arith.constant 0 : i32
    return %arg0, %c0_i32 : i32, i32
  }
}

</mosaic_0001>

<bundles_post_ra>
// kernel: tpu_custom_call.1
= control target key start
LH: loop header
LB: loop body
LE: loop exit
PB: predicated region body
PF: predicated region fallthrough
CT: control target
= control target key end

     0   :  { %s4401_s0 = inlined_call_operand.vmem [shape: f32[1024,32], index: 0, kind: input, shape index: {}]   ;;  %s4402_s1 = inlined_call_operand.vmem [shape: f32[1024,8], index: 1, kind: input, shape index: {}]   ;;  %s4403_s2 = inlined_call_operand.vmem [shape: f32[1024,1], index: 2, kind: input, shape index: {}]   ;;  %s4404_s3 = inlined_call_operand.vmem [shape: f32[32,32], index: 3, kind: input, shape index: {}]   ;;  %s4405_s4 = inlined_call_operand.vmem [shape: f32[1,32], index: 4, kind: input, shape index: {}]   ;;  %s4406_s5 = inlined_call_operand.vmem [shape: f32[32,8], index: 5, kind: input, shape index: {}]   ;;  %s4407_s6 = inlined_call_operand.vmem [shape: f32[1,8], index: 6, kind: input, shape index: {}]   ;;  %s4408_s7 = inlined_call_operand.vmem [shape: f32[1,8], index: 7, kind: input, shape index: {}]   ;;  %s4409_s8 = inlined_call_operand.vmem [shape: f32[1,8], index: 8, kind: input, shape index: {}]   ;;  %s4410_s9 = inlined_call_operand.hbm [shape: f32[16,128], index: 9, kind: output, shape index: {}]  }
   0x1   :  { %4411 = sst [smem:[#allocation6_spill]] %s4401_s0 }
   0x2   :  { %4412 = sst [smem:[#allocation7_spill]] %s4402_s1 }
   0x3   :  { %4413 = sst [smem:[#allocation8_spill]] %s4403_s2 }
   0x4   :  { %14 = vsyncpa [#allocation4], 0 }
   0x5   :  { %16 = vsyncpa [#allocation4 + $0x1], 0  ;;  %s3257_s30 = smov 0   ;;  %s3259_s10 = smov 0  }
   0x6   :  { %s3261_s11 = smov 0   ;;  %s3263_s12 = smov 0  }
   0x7   :  { %s3265_s13 = smov 0   ;;  %s3267_s14 = smov 0  }
   0x8 LB: > { %s2772_s15 = sadd.s32 4294967295, %s3203_s14   ;;  %s2773_s16 = sadd.s32 4294967294, %s3203_s14   ;;  %s3203_s14 = sphi %s3267_s14, %s22_s14   ;;  %s3199_s13 = sphi %s3265_s13, %s4423_s13   ;;  %s3195_s12 = sphi %s3263_s12, %s4422_s12   ;;  %s3191_s11 = sphi %s3261_s11, %s4421_s11   ;;  %s3187_s10 = sphi %s3259_s10, %s4420_s10   ;;  %s3183_s30 = sphi %s3257_s30, %s4419_s30  }
   0x9   : > { %s34_s17 = sadd.s32 1, %s3199_s13  ;;  %s251_s18 = sadd.s32 1, %s3191_s11 }
   0xa   : > { %p36_p0 = scmp.ge.s32.totalorder %s34_s17, 2  ;;  %p261_p1 = scmp.ne.s32.totalorder %s3191_s11, %s3187_s10 }
   0xb   : > { %p262_p2 = scmp.eq.s32.totalorder %s2772_s15, 1  ;;  %p267_p3 = scmp.ne.s32.totalorder %s3187_s10, %s3183_s30 }
   0xc   : > { %s4425_s17 = smov (%p36_p0, %s34_s17), 0  ;;  %p268_p5 = scmp.eq.s32.totalorder %s2773_s16, 1 }
   0xd   : > { %p3297_p4 = por %p262_p2, %p261_p1  ;;  %s248_s20 = ssub.s32 %s3199_s13, %s4425_s17 }
   0xe   : > { %p2776_p6 = scmp.ge.s32.totalorder %s3203_s14, 1  ;;  %p249_p7 = scmp.eq.s32.totalorder %s248_s20, 0 }
   0xf   : > { %p3304_p8 = por %p268_p5, %p267_p3  ;;  %p337_p9 = scmp.lt.s32.totalorder %s3203_s14, 3 }
  0x10   : > { %s3310_s22 = scalar_select %p249_p7, %s3191_s11, %s251_s18  }
  0x11   : > { %p338_p10 = pnand %p2776_p6, %p337_p9 }
  0x12   : > { %s2778_s27 = sshll.u32 (!%p338_p10), %s3195_s12, 6  ;;  %s4416_s0 = sld [smem:[#allocation6_spill]] (!%p338_p10) }
  0x13   : > { %341 = sbr.rel (%p338_p10) target bundleno = 816 (0x330), region = 56  ;;  %p388_p11 = scmp.lt.s32.totalorder (!%p338_p10), %s2778_s27, 127 }
  0x14   : > { %s4417_s2 = sld [smem:[#allocation8_spill]] (!%p338_p10)  ;;  %s2913_s23 = sshll.u32 (!%p338_p10), %s3195_s12, 3 }
  0x15   : > { %s4418_s1 = sld [smem:[#allocation7_spill]] (!%p338_p10)  ;;  %s2676_s26 = scalar_lea.hbm (!%p338_p10), %s4410_s9, %s2913_s23 }
  0x18   : > { %v546_v0 = vld [vmem:[%s4404_s3 + $0x18] sm:$0xff]  ;;  %v545_v1 = vld [vmem:[%s4404_s3 + $0x10] sm:$0xff]  ;;  %v544_v2 = vld [vmem:[%s4404_s3 + $0x8] sm:$0xff]  ;;  %s4427_s27 = smov (!%p388_p11, %s2778_s27), 127  ;;  %vm551_vm0 = vcmask 261120   ;;  %v3205_v35 = vmov 0  }
  0x19   : > { %756 = vmatpush.msra.mxu0 %v546_v0  ;;  %2916 = vmatpush.msra.mxu2 %v546_v0  ;;  %v543_v3 = vld [vmem:[%s4404_s3] sm:$0xff]  ;;  %s3325_s18 = sshll.u32 %s4427_s27, 3  ;;  %v1020_v30 = vld [vmem:[%s4406_s5 + $0x18] sm:$0xff]  ;;  %v1019_v31 = vld [vmem:[%s4406_s5 + $0x10] sm:$0xff]  ;;  %vm414_vm1 = vcmask 64512  }
  0x1a   : > { %s3331_s24 = scalar_lea.vmem %s4416_s0, %s3325_s18  ;;  %1229 = vmatpush.msra.mxu1 %v1020_v30  ;;  %2920 = vmatpush.msra.mxu3 %v1020_v30  ;;  %s3395_s16 = scalar_lea.vmem %s4417_s2, %s3325_s18  ;;  %v1018_v32 = vld [vmem:[%s4406_s5 + $0x8] sm:$0xff]  ;;  %v1017_v36 = vld [vmem:[%s4406_s5] sm:$0xff] }
  0x1b   : > { %757 = vmatpush.msra.mxu0 %v545_v1  ;;  %2917 = vmatpush.msra.mxu2 %v545_v1  ;;  %v479_v4 = vld [vmem:[%s3331_s24] sm:$0xff]  ;;  %v480_v6 = vld [vmem:[%s3331_s24 + $0x8] sm:$0xff]  ;;  %v481_v8 = vld [vmem:[%s3331_s24 + $0x10] sm:$0xff]  ;;  %s3674_s15 = scalar_lea.vmem %s4418_s1, %s3325_s18 }
  0x1c   : > { %v511_v5 = vld [vmem:[%s3331_s24 + $0x100] sm:$0xff]  ;;  %v512_v7 = vld [vmem:[%s3331_s24 + $0x108] sm:$0xff]  ;;  %v513_v9 = vld [vmem:[%s3331_s24 + $0x110] sm:$0xff]  ;;  %1230 = vmatpush.msra.mxu1 %v1019_v31  ;;  %2921 = vmatpush.msra.mxu3 %v1019_v31 }
  0x1d   : > { %758 = vmatpush.msra.mxu0 %v544_v2  ;;  %2918 = vmatpush.msra.mxu2 %v544_v2  ;;  %v482_v10 = vld [vmem:[%s3331_s24 + $0x18] sm:$0xff]  ;;  %v483_v12 = vld [vmem:[%s3331_s24 + $0x20] sm:$0xff]  ;;  %v484_v14 = vld [vmem:[%s3331_s24 + $0x28] sm:$0xff] }
  0x1e   : > { %v514_v11 = vld [vmem:[%s3331_s24 + $0x118] sm:$0xff]  ;;  %v515_v13 = vld [vmem:[%s3331_s24 + $0x120] sm:$0xff]  ;;  %v516_v15 = vld [vmem:[%s3331_s24 + $0x128] sm:$0xff]  ;;  %1231 = vmatpush.msra.mxu1 %v1018_v32  ;;  %2983 = vset.pattern.permute.xlu0 %v3205_v35 }
  0x1f   : > { %759 = vmatpush.msra.mxu0 %v543_v3  ;;  %2919 = vmatpush.msra.mxu2 %v543_v3  ;;  %v485_v16 = vld [vmem:[%s3331_s24 + $0x30] sm:$0xff]  ;;  %v486_v18 = vld [vmem:[%s3331_s24 + $0x38] sm:$0xff]  ;;  %v487_v20 = vld [vmem:[%s3331_s24 + $0x40] sm:$0xff] }
  0x20   : > { %2784 = vmatmul.msk.f32.vlgmr.msra.gmra.mxu0 %vm551_vm0, %v479_v4  ;;  %2816 = vmatmul.msk.f32.vlgmr.msra.gmra.mxu2 %vm551_vm0, %v511_v5  ;;  %v517_v17 = vld [vmem:[%s3331_s24 + $0x130] sm:$0xff]  ;;  %v518_v19 = vld [vmem:[%s3331_s24 + $0x138] sm:$0xff]  ;;  %v519_v21 = vld [vmem:[%s3331_s24 + $0x140] sm:$0xff] }
  0x21   : > { %v488_v22 = vld [vmem:[%s3331_s24 + $0x48] sm:$0xff]  ;;  %v489_v24 = vld [vmem:[%s3331_s24 + $0x50] sm:$0xff]  ;;  %v490_v26 = vld [vmem:[%s3331_s24 + $0x58] sm:$0xff]  ;;  %2922 = vmatpush.msra.mxu3 %v1018_v32  ;;  %1232 = vmatpush.msra.mxu1 %v1017_v36 }
  0x22   : > { %v520_v23 = vld [vmem:[%s3331_s24 + $0x148] sm:$0xff]  ;;  %v521_v25 = vld [vmem:[%s3331_s24 + $0x150] sm:$0xff]  ;;  %v522_v27 = vld [vmem:[%s3331_s24 + $0x158] sm:$0xff]  ;;  %2984 = vset.pattern.permute.xlu1 %v3205_v35  ;;  %2985 = vset.pattern.permute.xlu2 %v3205_v35 }
  0x23   : > { %v491_v28 = vld [vmem:[%s3331_s24 + $0x60] sm:$0xff]  ;;  %v492_v33 = vld [vmem:[%s3331_s24 + $0x68] sm:$0xff]  ;;  %2923 = vmatpush.msra.mxu3 %v1017_v36  ;;  %v493_v38 = vld [vmem:[%s3331_s24 + $0x70] sm:$0xff] }
  0x24   : > { %v523_v29 = vld [vmem:[%s3331_s24 + $0x160] sm:$0xff]  ;;  %v524_v34 = vld [vmem:[%s3331_s24 + $0x168] sm:$0xff]  ;;  %v525_v39 = vld [vmem:[%s3331_s24 + $0x170] sm:$0xff] }
  0x25   : > { %v1882_v37 = vld [vmem:[%s3395_s16] sm:$0xff]  ;;  %v1883_v40 = vld [vmem:[%s3395_s16 + $0x8] sm:$0xff]  ;;  %v1884_v41 = vld [vmem:[%s3395_s16 + $0x10] sm:$0xff] }
  0x26   : > { %1948 = vperm.xlu0 %2983, %v1882_v37   ;;  %1958 = vperm.xlu1 %2984, %v1884_v41   ;;  %v494_v42 = vld [vmem:[%s3331_s24 + $0x78] sm:$0xff]  ;;  %v1888_v44 = vld [vmem:[%s3395_s16 + $0x30] sm:$0xff]  ;;  %v3423_v46 = vld [vmem:[%s4405_s4] ss:$0 sm:$0xff] }
  0x27   : > { %v526_v43 = vld [vmem:[%s3331_s24 + $0x178] sm:$0xff]  ;;  %v495_v48 = vld [vmem:[%s3331_s24 + $0x80] sm:$0xff]  ;;  %v1891_v50 = vld [vmem:[%s3395_s16 + $0x48] sm:$0xff] }
  0x28   : > { %2785 = vmatmul.msk.f32.gmra.mxu0 %vm551_vm0, %v480_v6  ;;  %2817 = vmatmul.msk.f32.gmra.mxu2 %vm551_vm0, %v512_v7  ;;  %v1885_v45 = vld [vmem:[%s3395_s16 + $0x18] sm:$0xff]  ;;  %v527_v49 = vld [vmem:[%s3331_s24 + $0x180] sm:$0xff]  ;;  %v496_v55 = vld [vmem:[%s3331_s24 + $0x88] sm:$0xff] }
  0x29   : > { %v1889_v52 = vld [vmem:[%s3395_s16 + $0x38] sm:$0xff]  ;;  %v528_v57 = vld [vmem:[%s3331_s24 + $0x188] sm:$0xff]  ;;  %v1886_v58 = vld [vmem:[%s3395_s16 + $0x20] sm:$0xff] }
  0x2a   : > { %v1894_v59 = vld [vmem:[%s3395_s16 + $0x60] sm:$0xff]  ;;  %1968 = vperm.xlu2 %2985, %v1886_v58   ;;  %v1892_v62 = vld [vmem:[%s3395_s16 + $0x50] sm:$0xff]  ;;  %v1887_v5 = vld [vmem:[%s3395_s16 + $0x28] sm:$0xff] }
  0x2b   : > { %v497_v2 = vld [vmem:[%s3331_s24 + $0x90] sm:$0xff]  ;;  %v1897_v6 = vld [vmem:[%s3395_s16 + $0x78] sm:$0xff]  ;;  %v500_v35 = vld [vmem:[%s3331_s24 + $0xa8] sm:$0xff] }
  0x2c   : > { %v529_v4 = vld [vmem:[%s3331_s24 + $0x190] sm:$0xff]  ;;  %v1901_v31 = vld [vmem:[%s3395_s16 + $0x98] sm:$0xff]  ;;  %v532_v37 = vld [vmem:[%s3331_s24 + $0x1a8] sm:$0xff] }
  0x2d   : > { %v502_v58 = vld [vmem:[%s3331_s24 + $0xb8] sm:$0xff] }
  0x2e   : > { %1953 = vperm.xlu0 %2983, %v1883_v40   ;;  %1963 = vperm.xlu1 %2984, %v1885_v45  }
  0x30   : > { %2786 = vmatmul.msk.f32.gmra.mxu0 %vm551_vm0, %v481_v8  ;;  %2818 = vmatmul.msk.f32.gmra.mxu2 %vm551_vm0, %v513_v9  ;;  %v1895_v9 = vld [vmem:[%s3395_s16 + $0x68] sm:$0xff] }
  0x32   : > { %1973 = vperm.xlu2 %2985, %v1887_v5   ;;  %v503_v5 = vld [vmem:[%s3331_s24 + $0xc0] sm:$0xff] }
  0x36   : > { %1978 = vperm.xlu0 %2983, %v1888_v44   ;;  %1983 = vperm.xlu1 %2984, %v1889_v52  }
  0x38   : > { %2787 = vmatmul.msk.f32.gmra.mxu0 %vm551_vm0, %v482_v10  ;;  %2819 = vmatmul.msk.f32.gmra.mxu2 %vm551_vm0, %v514_v11 }
  0x3e   : > { %1993 = vperm.xlu0 %2983, %v1891_v50   ;;  %1998 = vperm.xlu1 %2984, %v1892_v62   ;;  %v1899_v50 = vld [vmem:[%s3395_s16 + $0x88] sm:$0xff]  ;;  %v1912_v62 = vld [vmem:[%s3395_s16 + $0xf0] sm:$0xff] }
  0x40   : > { %2788 = vmatmul.msk.f32.gmra.mxu0 %vm551_vm0, %v483_v12  ;;  %2820 = vmatmul.msk.f32.gmra.mxu2 %vm551_vm0, %v515_v13  ;;  %v498_v13 = vld [vmem:[%s3331_s24 + $0x98] sm:$0xff] }
  0x46   : > { %2008 = vperm.xlu0 %2983, %v1894_v59   ;;  %2013 = vperm.xlu1 %2984, %v1895_v9   ;;  %v1915_v9 = vld [vmem:[%s3395_s16 + $0x108] sm:$0xff] }
  0x48   : > { %2789 = vmatmul.msk.f32.gmra.mxu0 %vm551_vm0, %v484_v14  ;;  %2821 = vmatmul.msk.f32.gmra.mxu2 %vm551_vm0, %v516_v15  ;;  %v530_v15 = vld [vmem:[%s3331_s24 + $0x198] sm:$0xff] }
  0x4e   : > { %2023 = vperm.xlu0 %2983, %v1897_v6  }
  0x50   : > { %2790 = vmatmul.msk.f32.gmra.mxu0 %vm551_vm0, %v485_v16  ;;  %2822 = vmatmul.msk.f32.gmra.mxu2 %vm551_vm0, %v517_v17  ;;  %v1890_v16 = vld [vmem:[%s3395_s16 + $0x40] sm:$0xff]  ;;  %v1900_v17 = vld [vmem:[%s3395_s16 + $0x90] sm:$0xff] }
  0x51   : > { %1988 = vperm.xlu2 %2985, %v1890_v16   ;;  %v504_v16 = vld [vmem:[%s3331_s24 + $0xc8] sm:$0xff] }
  0x56   : > { %2038 = vperm.xlu0 %2983, %v1900_v17  }
  0x58   : > { %2791 = vmatmul.msk.f32.gmra.mxu0 %vm551_vm0, %v486_v18  ;;  %2823 = vmatmul.msk.f32.gmra.mxu2 %vm551_vm0, %v518_v19 }
  0x60   : > { %2792 = vmatmul.msk.f32.gmra.mxu0 %vm551_vm0, %v487_v20  ;;  %2824 = vmatmul.msk.f32.gmra.mxu2 %vm551_vm0, %v519_v21  ;;  %v1898_v20 = vld [vmem:[%s3395_s16 + $0x80] sm:$0xff] }
  0x61   : > { %2028 = vperm.xlu1 %2984, %v1898_v20   ;;  %v1918_v20 = vld [vmem:[%s3395_s16 + $0x120] sm:$0xff] }
  0x68   : > { %2793 = vmatmul.msk.f32.gmra.mxu0 %vm551_vm0, %v488_v22  ;;  %2825 = vmatmul.msk.f32.gmra.mxu2 %vm551_vm0, %v520_v23 }
  0x69   : > { %2043 = vperm.xlu1 %2984, %v1901_v31   ;;  %v1921_v31 = vld [vmem:[%s3395_s16 + $0x138] sm:$0xff] }
  0x70   : > { %2794 = vmatmul.msk.f32.gmra.mxu0 %vm551_vm0, %v489_v24  ;;  %2826 = vmatmul.msk.f32.gmra.mxu2 %vm551_vm0, %v521_v25  ;;  %v499_v24 = vld [vmem:[%s3331_s24 + $0xa0] sm:$0xff] }
  0x78   : > { %2795 = vmatmul.msk.f32.gmra.mxu0 %vm551_vm0, %v490_v26  ;;  %2827 = vmatmul.msk.f32.gmra.mxu2 %vm551_vm0, %v522_v27  ;;  %v531_v26 = vld [vmem:[%s3331_s24 + $0x1a0] sm:$0xff]  ;;  %v1893_v27 = vld [vmem:[%s3395_s16 + $0x58] sm:$0xff] }
  0x79   : > { %2003 = vperm.xlu2 %2985, %v1893_v27   ;;  %v505_v27 = vld [vmem:[%s3331_s24 + $0xd0] sm:$0xff] }
  0x80   : > { %2796 = vmatmul.msk.f32.gmra.mxu0 %vm551_vm0, %v491_v28  ;;  %2828 = vmatmul.msk.f32.gmra.mxu2 %vm551_vm0, %v523_v29  ;;  %v1903_v28 = vld [vmem:[%s3395_s16 + $0xa8] sm:$0xff] }
  0x81   : > { %2053 = vperm.xlu0 %2983, %v1903_v28  }
  0x88   : > { %2797 = vmatmul.msk.f32.gmra.mxu0 %vm551_vm0, %v492_v33  ;;  %2829 = vmatmul.msk.f32.gmra.mxu2 %vm551_vm0, %v524_v34 }
  0x90   : > { %2798 = vmatmul.msk.f32.gmra.mxu0 %vm551_vm0, %v493_v38  ;;  %2830 = vmatmul.msk.f32.gmra.mxu2 %vm551_vm0, %v525_v39  ;;  %v1896_v38 = vld [vmem:[%s3395_s16 + $0x70] sm:$0xff]  ;;  %v1906_v39 = vld [vmem:[%s3395_s16 + $0xc0] sm:$0xff] }
  0x91   : > { %2018 = vperm.xlu2 %2985, %v1896_v38   ;;  %2068 = vperm.xlu0 %2983, %v1906_v39   ;;  %v506_v38 = vld [vmem:[%s3331_s24 + $0xd8] sm:$0xff] }
  0x98   : > { %2799 = vmatmul.msk.f32.gmra.mxu0 %vm551_vm0, %v494_v42  ;;  %2831 = vmatmul.msk.f32.gmra.mxu2 %vm551_vm0, %v526_v43  ;;  %v1904_v42 = vld [vmem:[%s3395_s16 + $0xb0] sm:$0xff] }
  0x99   : > { %2058 = vperm.xlu1 %2984, %v1904_v42   ;;  %2033 = vperm.xlu2 %2985, %v1899_v50   ;;  %v1924_v42 = vld [vmem:[%s3395_s16 + $0x150] sm:$0xff] }
  0x9d   : > { %v761_v47 = vpop.f32.mrf.mxu0 }
  0x9e   : > { %v762_v51 = vadd.f32 %v3423_v46, %v761_v47  ;;  %v501_v47 = vld [vmem:[%s3331_s24 + $0xb0] sm:$0xff] }
  0xa0   : > { %2990 = vtanh.f32 %v762_v51  ;;  %2800 = vmatmul.msk.f32.gmra.mxu0 %vm551_vm0, %v495_v48  ;;  %2832 = vmatmul.msk.f32.gmra.mxu2 %vm551_vm0, %v527_v49  ;;  %v533_v49 = vld [vmem:[%s3331_s24 + $0x1b0] sm:$0xff]  ;;  %v1909_v51 = vld [vmem:[%s3395_s16 + $0xd8] sm:$0xff] }
  0xa1   : > { %2083 = vperm.xlu0 %2983, %v1909_v51   ;;  %v507_v51 = vld [vmem:[%s3331_s24 + $0xe0] sm:$0xff] }
  0xa3   : > { %v857_v53 = vpop.f32.mrf.mxu2 }
  0xa4   : > { %v858_v54 = vadd.f32 %v3423_v46, %v857_v53 }
  0xa5   : > { %v764_v56 = vpop.f32.mrf.mxu0 }
  0xa6   : > { %v2991_v60 = vpop.eup %2990  ;;  %2992 = vtanh.f32 %v858_v54  ;;  %v765_v61 = vadd.f32 %v3423_v46, %v764_v56  ;;  %v1907_v54 = vld [vmem:[%s3395_s16 + $0xc8] sm:$0xff] }
  0xa7   : > { %2848 = vmatmul.msk.f32.vlgmr.msra.gmra.mxu1 %vm551_vm0, %v2991_v60  ;;  %2073 = vperm.xlu1 %2984, %v1907_v54   ;;  %v534_v60 = vld [vmem:[%s3331_s24 + $0x1b8] sm:$0xff] }
  0xa8   : > { %2994 = vtanh.f32 %v765_v61  ;;  %2801 = vmatmul.msk.f32.gmra.mxu0 %vm551_vm0, %v496_v55  ;;  %2833 = vmatmul.msk.f32.gmra.mxu2 %vm551_vm0, %v528_v57  ;;  %v1902_v61 = vld [vmem:[%s3395_s16 + $0xa0] sm:$0xff] }
  0xa9   : > { %2048 = vperm.xlu2 %2985, %v1902_v61   ;;  %2098 = vperm.xlu0 %2983, %v1912_v62  }
  0xab   : > { %v860_v63 = vpop.f32.mrf.mxu2 }
  0xac   : > { %v2993_v0 = vpop.eup %2992  ;;  %v861_v1 = vadd.f32 %v3423_v46, %v860_v63 }
  0xad   : > { %v767_v3 = vpop.f32.mrf.mxu0  ;;  %2880 = vmatmul.msk.f32.vlgmr.msra.gmra.mxu3 %vm551_vm0, %v2993_v0 }
  0xae   : > { %v2995_v7 = vpop.eup %2994  ;;  %2996 = vtanh.f32 %v861_v1  ;;  %v768_v8 = vadd.f32 %v3423_v46, %v767_v3  ;;  %v1910_v1 = vld [vmem:[%s3395_s16 + $0xe0] sm:$0xff] }
  0xaf   : > { %2849 = vmatmul.msk.f32.gmra.mxu1 %vm551_vm0, %v2995_v7  ;;  %2088 = vperm.xlu1 %2984, %v1910_v1   ;;  %v535_v7 = vld [vmem:[%s3331_s24 + $0x1c0] sm:$0xff] }
  0xb0   : > { %2998 = vtanh.f32 %v768_v8  ;;  %2802 = vmatmul.msk.f32.gmra.mxu0 %vm551_vm0, %v497_v2  ;;  %2834 = vmatmul.msk.f32.gmra.mxu2 %vm551_vm0, %v529_v4  ;;  %v1905_v8 = vld [vmem:[%s3395_s16 + $0xb8] sm:$0xff]  ;;  %v1930_v1 = vld [vmem:[%s3395_s16 + $0x180] sm:$0xff] }
  0xb1   : > { %2063 = vperm.xlu2 %2985, %v1905_v8   ;;  %2113 = vperm.xlu0 %2983, %v1915_v9   ;;  %v3587_v9 = vpop.permute.xlu1 %1958 }
  0xb3   : > { %v863_v10 = vpop.f32.mrf.mxu2 }
  0xb4   : > { %v2997_v11 = vpop.eup %2996  ;;  %v864_v12 = vadd.f32 %v3423_v46, %v863_v10 }
  0xb5   : > { %v770_v14 = vpop.f32.mrf.mxu0  ;;  %2881 = vmatmul.msk.f32.gmra.mxu3 %vm551_vm0, %v2997_v11 }
  0xb6   : > { %v2999_v18 = vpop.eup %2998  ;;  %3000 = vtanh.f32 %v864_v12  ;;  %v771_v19 = vadd.f32 %v3423_v46, %v770_v14  ;;  %v1913_v12 = vld [vmem:[%s3395_s16 + $0xf8] sm:$0xff] }
  0xb7   : > { %2850 = vmatmul.msk.f32.gmra.mxu1 %vm551_vm0, %v2999_v18  ;;  %2103 = vperm.xlu1 %2984, %v1913_v12   ;;  %v536_v18 = vld [vmem:[%s3331_s24 + $0x1c8] sm:$0xff] }
  0xb8   : > { %3002 = vtanh.f32 %v771_v19  ;;  %2803 = vmatmul.msk.f32.gmra.mxu0 %vm551_vm0, %v498_v13  ;;  %2835 = vmatmul.msk.f32.gmra.mxu2 %vm551_vm0, %v530_v15  ;;  %v1908_v19 = vld [vmem:[%s3395_s16 + $0xd0] sm:$0xff] }
  0xb9   : > { %2078 = vperm.xlu2 %2985, %v1908_v19   ;;  %2128 = vperm.xlu0 %2983, %v1918_v20  }
  0xbb   : > { %v866_v21 = vpop.f32.mrf.mxu2 }
  0xbc   : > { %v3001_v22 = vpop.eup %3000  ;;  %v867_v23 = vadd.f32 %v3423_v46, %v866_v21 }
  0xbd   : > { %v773_v25 = vpop.f32.mrf.mxu0  ;;  %2882 = vmatmul.msk.f32.gmra.mxu3 %vm551_vm0, %v3001_v22 }
  0xbe   : > { %v3003_v29 = vpop.eup %3002  ;;  %3004 = vtanh.f32 %v867_v23  ;;  %v774_v30 = vadd.f32 %v3423_v46, %v773_v25  ;;  %v1916_v23 = vld [vmem:[%s3395_s16 + $0x110] sm:$0xff] }
  0xbf   : > { %2851 = vmatmul.msk.f32.gmra.mxu1 %vm551_vm0, %v3003_v29  ;;  %2118 = vperm.xlu1 %2984, %v1916_v23   ;;  %v537_v29 = vld [vmem:[%s3331_s24 + $0x1d0] sm:$0xff] }
  0xc0   : > { %3006 = vtanh.f32 %v774_v30  ;;  %2804 = vmatmul.msk.f32.gmra.mxu0 %vm551_vm0, %v499_v24  ;;  %2836 = vmatmul.msk.f32.gmra.mxu2 %vm551_vm0, %v531_v26  ;;  %v1911_v30 = vld [vmem:[%s3395_s16 + $0xe8] sm:$0xff] }
  0xc1   : > { %2093 = vperm.xlu2 %2985, %v1911_v30   ;;  %2143 = vperm.xlu0 %2983, %v1921_v31  }
  0xc3   : > { %v869_v32 = vpop.f32.mrf.mxu2 }
  0xc4   : > { %v3005_v33 = vpop.eup %3004  ;;  %v870_v34 = vadd.f32 %v3423_v46, %v869_v32 }
  0xc5   : > { %v776_v36 = vpop.f32.mrf.mxu0  ;;  %2883 = vmatmul.msk.f32.gmra.mxu3 %vm551_vm0, %v3005_v33 }
  0xc6   : > { %v3007_v40 = vpop.eup %3006  ;;  %3008 = vtanh.f32 %v870_v34  ;;  %v777_v41 = vadd.f32 %v3423_v46, %v776_v36  ;;  %v1919_v34 = vld [vmem:[%s3395_s16 + $0x128] sm:$0xff] }
  0xc7   : > { %2852 = vmatmul.msk.f32.gmra.mxu1 %vm551_vm0, %v3007_v40  ;;  %2133 = vperm.xlu1 %2984, %v1919_v34   ;;  %v538_v40 = vld [vmem:[%s3331_s24 + $0x1d8] sm:$0xff] }
  0xc8   : > { %3010 = vtanh.f32 %v777_v41  ;;  %2805 = vmatmul.msk.f32.gmra.mxu0 %vm551_vm0, %v500_v35  ;;  %2837 = vmatmul.msk.f32.gmra.mxu2 %vm551_vm0, %v532_v37  ;;  %v1914_v41 = vld [vmem:[%s3395_s16 + $0x100] sm:$0xff] }
  0xc9   : > { %2108 = vperm.xlu2 %2985, %v1914_v41   ;;  %2158 = vperm.xlu0 %2983, %v1924_v42   ;;  %v1936_v41 = vld [vmem:[%s3395_s16 + $0x1b0] sm:$0xff]  ;;  %v3679_v42 = vld [vmem:[%s4407_s6] ss:$0 sm:$0xff] }
  0xcb   : > { %v872_v43 = vpop.f32.mrf.mxu2 }
  0xcc   : > { %v3009_v44 = vpop.eup %3008  ;;  %v873_v45 = vadd.f32 %v3423_v46, %v872_v43 }
  0xcd   : > { %v779_v48 = vpop.f32.mrf.mxu0  ;;  %2884 = vmatmul.msk.f32.gmra.mxu3 %vm551_vm0, %v3009_v44 }
  0xce   : > { %v3011_v52 = vpop.eup %3010  ;;  %3012 = vtanh.f32 %v873_v45  ;;  %v780_v53 = vadd.f32 %v3423_v46, %v779_v48  ;;  %v1922_v45 = vld [vmem:[%s3395_s16 + $0x140] sm:$0xff] }
  0xcf   : > { %2853 = vmatmul.msk.f32.gmra.mxu1 %vm551_vm0, %v3011_v52  ;;  %2148 = vperm.xlu1 %2984, %v1922_v45   ;;  %v539_v52 = vld [vmem:[%s3331_s24 + $0x1e0] sm:$0xff] }
  0xd0   : > { %3014 = vtanh.f32 %v780_v53  ;;  %2806 = vmatmul.msk.f32.gmra.mxu0 %vm551_vm0, %v501_v47  ;;  %2838 = vmatmul.msk.f32.gmra.mxu2 %vm551_vm0, %v533_v49  ;;  %v1927_v53 = vld [vmem:[%s3395_s16 + $0x168] sm:$0xff] }
  0xd1   : > { %2173 = vperm.xlu0 %2983, %v1927_v53   ;;  %v3700_v53 = vld [vmem:[%s4408_s7] ss:$0 sm:$0xff] }
  0xd3   : > { %v875_v55 = vpop.f32.mrf.mxu2 }
  0xd4   : > { %v3013_v56 = vpop.eup %3012  ;;  %v876_v57 = vadd.f32 %v3423_v46, %v875_v55 }
  0xd5   : > { %v782_v59 = vpop.f32.mrf.mxu0  ;;  %2885 = vmatmul.msk.f32.gmra.mxu3 %vm551_vm0, %v3013_v56  ;;  %v3558_v56 = vpop.permute.xlu0 %1948 }
  0xd6   : > { %v3015_v63 = vpop.eup %3014  ;;  %3016 = vtanh.f32 %v876_v57  ;;  %v783_v0 = vadd.f32 %v3423_v46, %v782_v59  ;;  %v1925_v57 = vld [vmem:[%s3395_s16 + $0x158] sm:$0xff] }
  0xd7   : > { %2854 = vmatmul.msk.f32.gmra.mxu1 %vm551_vm0, %v3015_v63  ;;  %2163 = vperm.xlu1 %2984, %v1925_v57   ;;  %v1917_v59 = vld [vmem:[%s3395_s16 + $0x118] sm:$0xff]  ;;  %v508_v63 = vld [vmem:[%s3331_s24 + $0xe8] sm:$0xff] }
  0xd8   : > { %3018 = vtanh.f32 %v783_v0  ;;  %2807 = vmatmul.msk.f32.gmra.mxu0 %vm551_vm0, %v502_v58  ;;  %2839 = vmatmul.msk.f32.gmra.mxu2 %vm551_vm0, %v534_v60  ;;  %v540_v0 = vld [vmem:[%s3331_s24 + $0x1e8] sm:$0xff] }
  0xd9   : > { %2123 = vperm.xlu2 %2985, %v1917_v59   ;;  %2188 = vperm.xlu0 %2983, %v1930_v1  }
  0xdb   : > { %v878_v2 = vpop.f32.mrf.mxu2 }
  0xdc   : > { %v3017_v3 = vpop.eup %3016  ;;  %v879_v4 = vadd.f32 %v3423_v46, %v878_v2 }
  0xdd   : > { %v785_v6 = vpop.f32.mrf.mxu0  ;;  %2886 = vmatmul.msk.f32.gmra.mxu3 %vm551_vm0, %v3017_v3 }
  0xde   : > { %v3019_v10 = vpop.eup %3018  ;;  %3020 = vtanh.f32 %v879_v4  ;;  %v786_v11 = vadd.f32 %v3423_v46, %v785_v6  ;;  %v3572_v4 = vpop.permute.xlu2 %1968 }
  0xdf   : > { %2855 = vmatmul.msk.f32.gmra.mxu1 %vm551_vm0, %v3019_v10  ;;  %v3578_v6 = vpop.permute.xlu0 %1953  ;;  %v1920_v10 = vld [vmem:[%s3395_s16 + $0x130] sm:$0xff] }
  0xe0   : > { %3022 = vtanh.f32 %v786_v11  ;;  %2808 = vmatmul.msk.f32.gmra.mxu0 %vm551_vm0, %v503_v5  ;;  %2840 = vmatmul.msk.f32.gmra.mxu2 %vm551_vm0, %v535_v7  ;;  %v3206_v5 = vmov 0.0   ;;  %v1928_v7 = vld [vmem:[%s3395_s16 + $0x170] sm:$0xff] }
  0xe1   : > { %415 = vst.msk [vmem:[#allocation2] sm:$0xff] %vm414_vm1, %v3206_v5  ;;  %2178 = vperm.xlu1 %2984, %v1928_v7   ;;  %2138 = vperm.xlu2 %2985, %v1920_v10   ;;  %v1427_v10 = vld [vmem:[%s3674_s15 + $0x8] sm:$0xff] }
  0xe2   : > { %416 = vst.msk [vmem:[#allocation2 + $0x8] sm:$0xff] %vm414_vm1, %v3206_v5 }
  0xe3   : > { %v881_v13 = vpop.f32.mrf.mxu2  ;;  %417 = vst.msk [vmem:[#allocation2 + $0x10] sm:$0xff] %vm414_vm1, %v3206_v5 }
  0xe4   : > { %v3021_v14 = vpop.eup %3020  ;;  %v882_v15 = vadd.f32 %v3423_v46, %v881_v13  ;;  %418 = vst.msk [vmem:[#allocation2 + $0x18] sm:$0xff] %vm414_vm1, %v3206_v5 }
  0xe5   : > { %v788_v17 = vpop.f32.mrf.mxu0  ;;  %2887 = vmatmul.msk.f32.gmra.mxu3 %vm551_vm0, %v3021_v14  ;;  %419 = vst.msk [vmem:[#allocation2 + $0x20] sm:$0xff] %vm414_vm1, %v3206_v5  ;;  %v509_v14 = vld [vmem:[%s3331_s24 + $0xf0] sm:$0xff] }
  0xe6   : > { %v3023_v21 = vpop.eup %3022  ;;  %3024 = vtanh.f32 %v882_v15  ;;  %v789_v22 = vadd.f32 %v3423_v46, %v788_v17  ;;  %420 = vst.msk [vmem:[#allocation2 + $0x28] sm:$0xff] %vm414_vm1, %v3206_v5  ;;  %v541_v15 = vld [vmem:[%s3331_s24 + $0x1f0] sm:$0xff] }
  0xe7   : > { %2856 = vmatmul.msk.f32.gmra.mxu1 %vm551_vm0, %v3023_v21  ;;  %421 = vst.msk [vmem:[#allocation2 + $0x30] sm:$0xff] %vm414_vm1, %v3206_v5  ;;  %v3616_v19 = vpop.permute.xlu0 %1978 }
  0xe8   : > { %3026 = vtanh.f32 %v789_v22  ;;  %2809 = vmatmul.msk.f32.gmra.mxu0 %vm551_vm0, %v504_v16  ;;  %2841 = vmatmul.msk.f32.gmra.mxu2 %vm551_vm0, %v536_v18  ;;  %422 = vst.msk [vmem:[#allocation2 + $0x38] sm:$0xff] %vm414_vm1, %v3206_v5  ;;  %v3612_v18 = vpop.permute.xlu2 %1973 }
  0xe9   : > { %423 = vst.msk [vmem:[#allocation2 + $0x40] sm:$0xff] %vm414_vm1, %v3206_v5 }
  0xea   : > { %424 = vst.msk [vmem:[#allocation2 + $0x48] sm:$0xff] %vm414_vm1, %v3206_v5 }
  0xeb   : > { %v884_v24 = vpop.f32.mrf.mxu2  ;;  %425 = vst.msk [vmem:[#allocation2 + $0x50] sm:$0xff] %vm414_vm1, %v3206_v5 }
  0xec   : > { %v3025_v25 = vpop.eup %3024  ;;  %v885_v26 = vadd.f32 %v3423_v46, %v884_v24  ;;  %426 = vst.msk [vmem:[#allocation2 + $0x58] sm:$0xff] %vm414_vm1, %v3206_v5  ;;  %v510_v24 = vld [vmem:[%s3331_s24 + $0xf8] sm:$0xff] }
  0xed   : > { %v791_v28 = vpop.f32.mrf.mxu0  ;;  %2888 = vmatmul.msk.f32.gmra.mxu3 %vm551_vm0, %v3025_v25  ;;  %427 = vst.msk [vmem:[#allocation2 + $0x60] sm:$0xff] %vm414_vm1, %v3206_v5  ;;  %v542_v25 = vld [vmem:[%s3331_s24 + $0x1f8] sm:$0xff]  ;;  %s2680_s24 = sshll.u32 %s2676_s26, 4  ;;  %s2681_s24 = int_to_ptr.hbm [resolvable:$true] %s2680_s24 }
  0xee   : > { %v3027_v32 = vpop.eup %3026  ;;  %3028 = vtanh.f32 %v885_v26  ;;  %v792_v33 = vadd.f32 %v3423_v46, %v791_v28  ;;  %428 = vst.msk [vmem:[#allocation2 + $0x68] sm:$0xff] %vm414_vm1, %v3206_v5  ;;  %v3628_v26 = vpop.permute.xlu1 %1963  ;;  %s3139_s1 = sshra.s32 %s2681_s24, 4  ;;  %s3140_s1 = int_to_ptr.hbm [resolvable:$true] %s3139_s1 }
  0xef   : > { %2857 = vmatmul.msk.f32.gmra.mxu1 %vm551_vm0, %v3027_v32  ;;  %429 = vst.msk [vmem:[#allocation2 + $0x70] sm:$0xff] %vm414_vm1, %v3206_v5  ;;  %v3652_v34 = vpop.permute.xlu0 %1993  ;;  %s3141_s2 = scalar_lea.hbm %s3140_s1, 8  ;;  %p3146_p1 = scmp.lt.s32.totalorder %s3140_s1, %s4410_s9 }
  0xf0   : > { %3030 = vtanh.f32 %v792_v33  ;;  %2810 = vmatmul.msk.f32.gmra.mxu0 %vm551_vm0, %v505_v27  ;;  %2842 = vmatmul.msk.f32.gmra.mxu2 %vm551_vm0, %v537_v29  ;;  %430 = vst.msk [vmem:[#allocation2 + $0x78] sm:$0xff] %vm414_vm1, %v3206_v5  ;;  %v1933_v29 = vld [vmem:[%s3395_s16 + $0x198] sm:$0xff]  ;;  %v3647_v31 = vpop.permute.xlu2 %1988  ;;  %p3142_p12 = scmp.ne.s32.totalorder %s3140_s1, %s3141_s2 }
  0xf1   : > { %431 = vst.msk [vmem:[#allocation2 + $0x80] sm:$0xff] %vm414_vm1, %v3206_v5  ;;  %2203 = vperm.xlu0 %2983, %v1933_v29  }
  0xf2   : > { %432 = vst.msk [vmem:[#allocation2 + $0x88] sm:$0xff] %vm414_vm1, %v3206_v5  ;;  %p3143_p13 = pnand %p3142_p12, %p3297_p4 }
  0xf3   : > { %v887_v35 = vpop.f32.mrf.mxu2  ;;  %433 = vst.msk [vmem:[#allocation2 + $0x90] sm:$0xff] %vm414_vm1, %v3206_v5 }
  0xf4   : > { %v3029_v36 = vpop.eup %3028  ;;  %v888_v37 = vadd.f32 %v3423_v46, %v887_v35  ;;  %434 = vst.msk [vmem:[#allocation2 + $0x98] sm:$0xff] %vm414_vm1, %v3206_v5  ;;  %v1931_v35 = vld [vmem:[%s3395_s16 + $0x188] sm:$0xff]  ;;  %p3144_p0 = pneg %p3143_p13 }
  0xf5   : > { %v794_v39 = vpop.f32.mrf.mxu0  ;;  %2889 = vmatmul.msk.f32.gmra.mxu3 %vm551_vm0, %v3029_v36  ;;  %435 = vst.msk [vmem:[#allocation2 + $0xa0] sm:$0xff] %vm414_vm1, %v3206_v5  ;;  %2193 = vperm.xlu1 %2984, %v1931_v35  }
  0xf6   : > { %v3031_v43 = vpop.eup %3030  ;;  %3032 = vtanh.f32 %v888_v37  ;;  %v795_v44 = vadd.f32 %v3423_v46, %v794_v39  ;;  %436 = vst.msk [vmem:[#allocation2 + $0xa8] sm:$0xff] %vm414_vm1, %v3206_v5  ;;  %v1923_v39 = vld [vmem:[%s3395_s16 + $0x148] sm:$0xff] }
  0xf7   : > { %2858 = vmatmul.msk.f32.gmra.mxu1 %vm551_vm0, %v3031_v43  ;;  %437 = vst.msk [vmem:[#allocation2 + $0xb0] sm:$0xff] %vm414_vm1, %v3206_v5  ;;  %2153 = vperm.xlu2 %2985, %v1923_v39  }
  0xf8   : > { %3034 = vtanh.f32 %v795_v44  ;;  %2811 = vmatmul.msk.f32.gmra.mxu0 %vm551_vm0, %v506_v38  ;;  %2843 = vmatmul.msk.f32.gmra.mxu2 %vm551_vm0, %v538_v40  ;;  %438 = vst.msk [vmem:[#allocation2 + $0xb8] sm:$0xff] %vm414_vm1, %v3206_v5  ;;  %v3665_v40 = vpop.permute.xlu1 %1983  ;;  %v3687_v44 = vpop.permute.xlu2 %2003 }
  0xf9   : > { %439 = vst.msk [vmem:[#allocation2 + $0xc0] sm:$0xff] %vm414_vm1, %v3206_v5  ;;  %2218 = vperm.xlu0 %2983, %v1936_v41   ;;  %v1940_v41 = vld [vmem:[%s3395_s16 + $0x1d0] sm:$0xff] }
  0xfa   : > { %440 = vst.msk [vmem:[#allocation2 + $0xc8] sm:$0xff] %vm414_vm1, %v3206_v5 }
  0xfb   : > { %v890_v47 = vpop.f32.mrf.mxu2  ;;  %441 = vst.msk [vmem:[#allocation2 + $0xd0] sm:$0xff] %vm414_vm1, %v3206_v5 }
  0xfc   : > { %v3033_v48 = vpop.eup %3032  ;;  %v891_v49 = vadd.f32 %v3423_v46, %v890_v47  ;;  %442 = vst.msk [vmem:[#allocation2 + $0xd8] sm:$0xff] %vm414_vm1, %v3206_v5 }
  0xfd   : > { %v797_v50 = vpop.f32.mrf.mxu0  ;;  %2890 = vmatmul.msk.f32.gmra.mxu3 %vm551_vm0, %v3033_v48  ;;  %443 = vst.msk [vmem:[#allocation2 + $0xe0] sm:$0xff] %vm414_vm1, %v3206_v5 }
  0xfe   : > { %v3035_v54 = vpop.eup %3034  ;;  %3036 = vtanh.f32 %v891_v49  ;;  %v798_v55 = vadd.f32 %v3423_v46, %v797_v50  ;;  %v1426_v49 = vld [vmem:[%s3674_s15] sm:$0xff]  ;;  %444 = vst.msk [vmem:[#allocation2 + $0xe8] sm:$0xff] %vm414_vm1, %v3206_v5  ;;  %v3693_v50 = vpop.permute.xlu0 %2008 }
  0xff   : > { %2859 = vmatmul.msk.f32.gmra.mxu1 %vm551_vm0, %v3035_v54  ;;  %445 = vst.msk [vmem:[#allocation2 + $0xf0] sm:$0xff] %vm414_vm1, %v3206_v5 }
 0x100   : > { %3038 = vtanh.f32 %v798_v55  ;;  %2812 = vmatmul.msk.f32.gmra.mxu0 %vm551_vm0, %v507_v51  ;;  %2844 = vmatmul.msk.f32.gmra.mxu2 %vm551_vm0, %v539_v52  ;;  %v1934_v51 = vld [vmem:[%s3395_s16 + $0x1a0] sm:$0xff]  ;;  %446 = vst.msk [vmem:[#allocation2 + $0xf8] sm:$0xff] %vm414_vm1, %v3206_v5 }
 0x101   : > { %2208 = vperm.xlu1 %2984, %v1934_v51   ;;  %447 = vst.msk [vmem:[#allocation2 + $0x100] sm:$0xff] %vm414_vm1, %v3206_v5 }
 0x102   : > { %448 = vst.msk [vmem:[#allocation2 + $0x108] sm:$0xff] %vm414_vm1, %v3206_v5 }
 0x103   : > { %v893_v58 = vpop.f32.mrf.mxu2  ;;  %449 = vst.msk [vmem:[#allocation2 + $0x110] sm:$0xff] %vm414_vm1, %v3206_v5 }
 0x104   : > { %v3037_v60 = vpop.eup %3036  ;;  %v894_v61 = vadd.f32 %v3423_v46, %v893_v58  ;;  %v1926_v58 = vld [vmem:[%s3395_s16 + $0x160] sm:$0xff]  ;;  %450 = vst.msk [vmem:[#allocation2 + $0x118] sm:$0xff] %vm414_vm1, %v3206_v5 }
 0x105   : > { %v800_v62 = vpop.f32.mrf.mxu0  ;;  %2891 = vmatmul.msk.f32.gmra.mxu3 %vm551_vm0, %v3037_v60  ;;  %2168 = vperm.xlu2 %2985, %v1926_v58   ;;  %v3712_v60 = vpop.permute.xlu1 %1998  ;;  %451 = vst.msk [vmem:[#allocation2 + $0x120] sm:$0xff] %vm414_vm1, %v3206_v5 }
 0x106   : > { %v3039_v2 = vpop.eup %3038  ;;  %3040 = vtanh.f32 %v894_v61  ;;  %v801_v3 = vadd.f32 %v3423_v46, %v800_v62  ;;  %v1939_v61 = vld [vmem:[%s3395_s16 + $0x1c8] sm:$0xff]  ;;  %452 = vst.msk [vmem:[#allocation2 + $0x128] sm:$0xff] %vm414_vm1, %v3206_v5 }
 0x107   : > { %2860 = vmatmul.msk.f32.gmra.mxu1 %vm551_vm0, %v3039_v2  ;;  %2233 = vperm.xlu0 %2983, %v1939_v61   ;;  %v3729_v2 = vpop.permute.xlu2 %2018  ;;  %453 = vst.msk [vmem:[#allocation2 + $0x130] sm:$0xff] %vm414_vm1, %v3206_v5 }
 0x108   : > { %3042 = vtanh.f32 %v801_v3  ;;  %2813 = vmatmul.msk.f32.gmra.mxu0 %vm551_vm0, %v508_v63  ;;  %2845 = vmatmul.msk.f32.gmra.mxu2 %vm551_vm0, %v540_v0  ;;  %v3725_v0 = vld [vmem:[%s4409_s8] ss:$0 sm:$0xff]  ;;  %454 = vst.msk [vmem:[#allocation2 + $0x138] sm:$0xff] %vm414_vm1, %v3206_v5 }
 0x109   : > { %455 = vst.msk [vmem:[#allocation2 + $0x140] sm:$0xff] %vm414_vm1, %v3206_v5 }
 0x10a   : > { %456 = vst.msk [vmem:[#allocation2 + $0x148] sm:$0xff] %vm414_vm1, %v3206_v5 }
 0x10b   : > { %v896_v8 = vpop.f32.mrf.mxu2  ;;  %457 = vst.msk [vmem:[#allocation2 + $0x150] sm:$0xff] %vm414_vm1, %v3206_v5 }
 0x10c   : > { %v3041_v11 = vpop.eup %3040  ;;  %v897_v12 = vadd.f32 %v3423_v46, %v896_v8  ;;  %458 = vst.msk [vmem:[#allocation2 + $0x158] sm:$0xff] %vm414_vm1, %v3206_v5 }
 0x10d   : > { %v803_v13 = vpop.f32.mrf.mxu0  ;;  %2892 = vmatmul.msk.f32.gmra.mxu3 %vm551_vm0, %v3041_v11  ;;  %v3735_v11 = vpop.permute.xlu0 %2023  ;;  %459 = vst.msk [vmem:[#allocation2 + $0x160] sm:$0xff] %vm414_vm1, %v3206_v5 }
 0x10e   : > { %v3043_v16 = vpop.eup %3042  ;;  %3044 = vtanh.f32 %v897_v12  ;;  %v804_v17 = vadd.f32 %v3423_v46, %v803_v13  ;;  %v1937_v12 = vld [vmem:[%s3395_s16 + $0x1b8] sm:$0xff]  ;;  %460 = vst.msk [vmem:[#allocation2 + $0x168] sm:$0xff] %vm414_vm1, %v3206_v5 }
 0x10f   : > { %2861 = vmatmul.msk.f32.gmra.mxu1 %vm551_vm0, %v3043_v16  ;;  %2223 = vperm.xlu1 %2984, %v1937_v12   ;;  %461 = vst.msk [vmem:[#allocation2 + $0x170] sm:$0xff] %vm414_vm1, %v3206_v5  ;;  %v1943_v12 = vld [vmem:[%s3395_s16 + $0x1e8] sm:$0xff] }
 0x110   : > { %3046 = vtanh.f32 %v804_v17  ;;  %2814 = vmatmul.msk.f32.gmra.mxu0 %vm551_vm0, %v509_v14  ;;  %2846 = vmatmul.msk.f32.gmra.mxu2 %vm551_vm0, %v541_v15  ;;  %462 = vst.msk [vmem:[#allocation2 + $0x178] sm:$0xff] %vm414_vm1, %v3206_v5 }
 0x111   : > { %463 = vst.msk [vmem:[#allocation2 + $0x180] sm:$0xff] %vm414_vm1, %v3206_v5 }
 0x112   : > { %464 = vst.msk [vmem:[#allocation2 + $0x188] sm:$0xff] %vm414_vm1, %v3206_v5 }
 0x113   : > { %v899_v20 = vpop.f32.mrf.mxu2  ;;  %465 = vst.msk [vmem:[#allocation2 + $0x190] sm:$0xff] %vm414_vm1, %v3206_v5 }
 0x114   : > { %v3045_v21 = vpop.eup %3044  ;;  %v900_v22 = vadd.f32 %v3423_v46, %v899_v20  ;;  %v1929_v20 = vld [vmem:[%s3395_s16 + $0x178] sm:$0xff]  ;;  %466 = vst.msk [vmem:[#allocation2 + $0x198] sm:$0xff] %vm414_vm1, %v3206_v5 }
 0x115   : > { %v806_v23 = vpop.f32.mrf.mxu0  ;;  %2893 = vmatmul.msk.f32.gmra.mxu3 %vm551_vm0, %v3045_v21  ;;  %2183 = vperm.xlu2 %2985, %v1929_v20   ;;  %v3771_v39 = vpop.permute.xlu0 %2038  ;;  %467 = vst.msk [vmem:[#allocation2 + $0x1a0] sm:$0xff] %vm414_vm1, %v3206_v5  ;;  %v1935_v20 = vld [vmem:[%s3395_s16 + $0x1a8] sm:$0xff] }
 0x116   : > { %v3047_v27 = vpop.eup %3046  ;;  %3048 = vtanh.f32 %v900_v22  ;;  %v807_v28 = vadd.f32 %v3423_v46, %v806_v23  ;;  %v3750_v23 = vpop.permute.xlu1 %2013  ;;  %468 = vst.msk [vmem:[#allocation2 + $0x1a8] sm:$0xff] %vm414_vm1, %v3206_v5 }
 0x117   : > { %2862 = vmatmul.msk.f32.gmra.mxu1 %vm551_vm0, %v3047_v27  ;;  %v1942_v27 = vld [vmem:[%s3395_s16 + $0x1e0] sm:$0xff]  ;;  %2238 = vperm.xlu1 %2984, %v1940_v41   ;;  %469 = vst.msk [vmem:[#allocation2 + $0x1b0] sm:$0xff] %vm414_vm1, %v3206_v5 }
 0x118   : > { %3050 = vtanh.f32 %v807_v28  ;;  %2815 = vmatmul.msk.f32.gmra.mxu0 %vm551_vm0, %v510_v24  ;;  %2847 = vmatmul.msk.f32.gmra.mxu2 %vm551_vm0, %v542_v25  ;;  %v1818_v24 = vld [vmem:[#allocation2] sm:$0xff]  ;;  %470 = vst.msk [vmem:[#allocation2 + $0x1b8] sm:$0xff] %vm414_vm1, %v3206_v5 }
 0x119   : > { %2248 = vperm.xlu0 %2983, %v1942_v27   ;;  %471 = vst.msk [vmem:[#allocation2 + $0x1c0] sm:$0xff] %vm414_vm1, %v3206_v5 }
 0x11a   : > { %472 = vst.msk [vmem:[#allocation2 + $0x1c8] sm:$0xff] %vm414_vm1, %v3206_v5 }
 0x11b   : > { %v902_v30 = vpop.f32.mrf.mxu2  ;;  %473 = vst.msk [vmem:[#allocation2 + $0x1d0] sm:$0xff] %vm414_vm1, %v3206_v5 }
 0x11c   : > { %v3049_v32 = vpop.eup %3048  ;;  %v903_v33 = vadd.f32 %v3423_v46, %v902_v30  ;;  %474 = vst.msk [vmem:[#allocation2 + $0x1d8] sm:$0xff] %vm414_vm1, %v3206_v5 }
 0x11d   : > { %v809_v36 = vpop.f32.mrf.mxu0  ;;  %2894 = vmatmul.msk.f32.gmra.mxu3 %vm551_vm0, %v3049_v32  ;;  %475 = vst.msk [vmem:[#allocation2 + $0x1e0] sm:$0xff] %vm414_vm1, %v3206_v5 }
 0x11e   : > { %v3051_v37 = vpop.eup %3050  ;;  %3052 = vtanh.f32 %v903_v33  ;;  %v810_v38 = vadd.f32 %v3423_v46, %v809_v36  ;;  %v3765_v33 = vpop.permute.xlu2 %2033  ;;  %476 = vst.msk [vmem:[#allocation2 + $0x1e8] sm:$0xff] %vm414_vm1, %v3206_v5 }
 0x11f   : > { %2863 = vmatmul.msk.f32.gmra.mxu1 %vm551_vm0, %v3051_v37  ;;  %2253 = vperm.xlu1 %2984, %v1943_v12   ;;  %477 = vst.msk [vmem:[#allocation2 + $0x1f0] sm:$0xff] %vm414_vm1, %v3206_v5 }
 0x120   : > { %3054 = vtanh.f32 %v810_v38  ;;  %v1428_v38 = vld [vmem:[%s3674_s15 + $0x10] sm:$0xff]  ;;  %478 = vst.msk [vmem:[#allocation2 + $0x1f8] sm:$0xff] %vm414_vm1, %v3206_v5 }
 0x123   : > { %v905_v43 = vpop.f32.mrf.mxu2 }
 0x124   : > { %v3053_v45 = vpop.eup %3052  ;;  %v906_v47 = vadd.f32 %v3423_v46, %v905_v43  ;;  %v1234_v48 = vpop.f32.mrf.mxu1 }
 0x125   : > { %v1235_v52 = vadd.f32 %v3679_v42, %v1234_v48  ;;  %v812_v54 = vpop.f32.mrf.mxu0  ;;  %2895 = vmatmul.msk.f32.gmra.mxu3 %vm551_vm0, %v3053_v45 }
 0x126   : > { %v3055_v55 = vpop.eup %3054  ;;  %3056 = vtanh.f32 %v906_v47  ;;  %v813_v57 = vadd.f32 %v3423_v46, %v812_v54 }
 0x127   : > { %v1490_v59 = vsub.f32 %v1426_v49, %v1235_v52  ;;  %2864 = vmatmul.msk.f32.gmra.mxu1 %vm551_vm0, %v3055_v55  ;;  %v1932_v49 = vld [vmem:[%s3395_s16 + $0x190] sm:$0xff]  ;;  %v3784_v52 = vpop.permute.xlu1 %2028 }
 0x128   : > { %3058 = vtanh.f32 %v813_v57  ;;  %2198 = vperm.xlu2 %2985, %v1932_v49   ;;  %v1945_v57 = vld [vmem:[%s3395_s16 + $0x1f8] sm:$0xff] }
 0x129   : > { %v1558_v62 = vmul.f32 %v3700_v53, %v1490_v59  ;;  %2263 = vperm.xlu0 %2983, %v1945_v57  }
 0x12b   : > { %v1622_v63 = vmul.f32 %v1558_v62, %v1558_v62  ;;  %v908_v1 = vpop.f32.mrf.mxu2  ;;  %v3798_v62 = vpop.permute.xlu2 %2048 }
 0x12c   : > { %v3057_v3 = vpop.eup %3056  ;;  %v909_v7 = vadd.f32 %v3423_v46, %v908_v1  ;;  %v1237_v8 = vpop.f32.mrf.mxu1 }
 0x12d   : > { %v1686_v13 = vmul.f32 0.5, %v1622_v63  ;;  %v1238_v14 = vadd.f32 %v3679_v42, %v1237_v8  ;;  %v815_v15 = vpop.f32.mrf.mxu0  ;;  %2896 = vmatmul.msk.f32.gmra.mxu3 %vm551_vm0, %v3057_v3  ;;  %v1429_v8 = vld [vmem:[%s3674_s15 + $0x18] sm:$0xff] }
 0x12e   : > { %v3059_v16 = vpop.eup %3058  ;;  %3060 = vtanh.f32 %v909_v7  ;;  %v816_v17 = vadd.f32 %v3423_v46, %v815_v15 }
 0x12f   : > { %v1754_v21 = vadd.f32 %v3725_v0, %v1686_v13  ;;  %v1491_v22 = vsub.f32 %v1427_v10, %v1238_v14  ;;  %2865 = vmatmul.msk.f32.gmra.mxu1 %vm551_vm0, %v3059_v16  ;;  %v3805_v10 = vpop.permute.xlu0 %2053 }
 0x130   : > { %3062 = vtanh.f32 %v816_v17  ;;  %v3754_v25 = vpop.f32.mrf.mxu3  ;;  %2213 = vperm.xlu2 %2985, %v1935_v20  }
 0x131   : > { %v2266_v28 = vmul.f32 %v3558_v56, %v1754_v21  ;;  %v1559_v29 = vmul.f32 %v3700_v53, %v1491_v22 }
 0x133   : > { %v2330_v30 = vadd.f32 %v2266_v28, %v1818_v24  ;;  %v911_v32 = vpop.f32.mrf.mxu2  ;;  %v1623_v56 = vmul.f32 %v1559_v29, %v1559_v29  ;;  %v3820_v24 = vpop.permute.xlu1 %2043 }
 0x134   : > { %v3061_v35 = vpop.eup %3060  ;;  %v912_v36 = vadd.f32 %v3423_v46, %v911_v32  ;;  %v1240_v37 = vpop.f32.mrf.mxu1  ;;  %v1820_v32 = vld [vmem:[#allocation2 + $0x10] sm:$0xff] }
 0x135   : > { %2395 = vst.msk [vmem:[#allocation2] sm:$0xff] %vm414_vm1, %v2330_v30  ;;  %v1241_v43 = vadd.f32 %v3679_v42, %v1240_v37  ;;  %v818_v45 = vpop.f32.mrf.mxu0  ;;  %2897 = vmatmul.msk.f32.gmra.mxu3 %vm551_vm0, %v3061_v35  ;;  %v1687_v54 = vmul.f32 0.5, %v1623_v56  ;;  %v3835_v56 = vpop.permute.xlu2 %2063 }
 0x136   : > { %v3063_v47 = vpop.eup %3062  ;;  %3064 = vtanh.f32 %v912_v36  ;;  %v819_v48 = vadd.f32 %v3423_v46, %v818_v45 }
 0x137   : > { %v1492_v51 = vsub.f32 %v1428_v38, %v1241_v43  ;;  %2866 = vmatmul.msk.f32.gmra.mxu1 %vm551_vm0, %v3063_v47  ;;  %v1755_v1 = vadd.f32 %v3725_v0, %v1687_v54  ;;  %v1430_v43 = vld [vmem:[%s3674_s15 + $0x20] sm:$0xff]  ;;  %v3853_v57 = vpop.permute.xlu0 %2068 }
 0x138   : > { %3066 = vtanh.f32 %v819_v48  ;;  %v3788_v55 = vpop.f32.mrf.mxu3 }
 0x139   : > { %v1560_v58 = vmul.f32 %v3700_v53, %v1492_v51  ;;  %v2267_v27 = vmul.f32 %v3578_v6, %v1755_v1  ;;  %v1821_v1 = vld [vmem:[#allocation2 + $0x18] sm:$0xff] }
 0x13b   : > { %v1624_v59 = vmul.f32 %v1560_v58, %v1560_v58  ;;  %v914_v61 = vpop.f32.mrf.mxu2  ;;  %v1938_v58 = vld [vmem:[%s3395_s16 + $0x1c0] sm:$0xff] }
 0x13c   : > { %v3065_v63 = vpop.eup %3064  ;;  %v915_v3 = vadd.f32 %v3423_v46, %v914_v61  ;;  %v1243_v7 = vpop.f32.mrf.mxu1  ;;  %2228 = vperm.xlu2 %2985, %v1938_v58   ;;  %v1334_v58 = vadd.f32 %v3679_v42, %v3788_v55  ;;  %v1944_v55 = vld [vmem:[%s3395_s16 + $0x1f0] sm:$0xff] }
 0x13d   : > { %v1688_v13 = vmul.f32 0.5, %v1624_v59  ;;  %v1244_v14 = vadd.f32 %v3679_v42, %v1243_v7  ;;  %v821_v15 = vpop.f32.mrf.mxu0  ;;  %2898 = vmatmul.msk.f32.gmra.mxu3 %vm551_vm0, %v3065_v63  ;;  %v3860_v63 = vpop.permute.xlu1 %2058 }
 0x13e   : > { %v3067_v16 = vpop.eup %3066  ;;  %3068 = vtanh.f32 %v915_v3  ;;  %v822_v17 = vadd.f32 %v3423_v46, %v821_v15  ;;  %v1819_v46 = vld [vmem:[#allocation2 + $0x8] sm:$0xff] }
 0x13f   : > { %v1756_v21 = vadd.f32 %v3725_v0, %v1688_v13  ;;  %v1493_v22 = vsub.f32 %v1429_v8, %v1244_v14  ;;  %2867 = vmatmul.msk.f32.gmra.mxu1 %vm551_vm0, %v3067_v16  ;;  %v2331_v37 = vadd.f32 %v2267_v27, %v1819_v46  ;;  %v3868_v14 = vpop.permute.xlu2 %2078  ;;  %v1331_v16 = vadd.f32 %v3679_v42, %v3754_v25 }
 0x140   : > { %3070 = vtanh.f32 %v822_v17  ;;  %v3825_v28 = vpop.f32.mrf.mxu3 }
 0x141   : > { %v2268_v29 = vmul.f32 %v3587_v9, %v1756_v21  ;;  %v1561_v30 = vmul.f32 %v3700_v53, %v1493_v22  ;;  %v3842_v9 = vld [vmem:[%s4405_s4] ss:$0 sm:$0xff]  ;;  %2396 = vst.msk [vmem:[#allocation2 + $0x8] sm:$0xff] %vm414_vm1, %v2331_v37  ;;  %v1431_v21 = vld [vmem:[%s3674_s15 + $0x28] sm:$0xff] }
 0x142   : > { %v1458_v22 = vld [vmem:[%s3674_s15 + $0x100] sm:$0xff] }
 0x143   : > { %v1625_v6 = vmul.f32 %v1561_v30, %v1561_v30  ;;  %v917_v35 = vpop.f32.mrf.mxu2  ;;  %v2332_v45 = vadd.f32 %v2268_v29, %v1820_v32  ;;  %v1941_v32 = vld [vmem:[%s3395_s16 + $0x1d8] sm:$0xff]  ;;  %v1822_v37 = vld [vmem:[#allocation2 + $0x20] sm:$0xff] }
 0x144   : > { %v3069_v36 = vpop.eup %3068  ;;  %v918_v38 = vadd.f32 %v3842_v9, %v917_v35  ;;  %v1246_v41 = vpop.f32.mrf.mxu1  ;;  %2243 = vperm.xlu2 %2985, %v1941_v32  }
 0x145   : > { %v1689_v47 = vmul.f32 0.5, %v1625_v6  ;;  %v1247_v48 = vadd.f32 %v3679_v42, %v1246_v41  ;;  %v824_v49 = vpop.f32.mrf.mxu0  ;;  %2899 = vmatmul.msk.f32.gmra.mxu3 %vm551_vm0, %v3069_v36  ;;  %2397 = vst.msk [vmem:[#allocation2 + $0x10] sm:$0xff] %vm414_vm1, %v2332_v45  ;;  %v3882_v35 = vpop.permute.xlu1 %2073  ;;  %v1522_v36 = vsub.f32 %v1458_v22, %v1331_v16 }
 0x146   : > { %v3071_v51 = vpop.eup %3070  ;;  %3072 = vtanh.f32 %v918_v38  ;;  %v825_v54 = vadd.f32 %v3842_v9, %v824_v49  ;;  %v3886_v41 = vpop.permute.xlu0 %2083 }
 0x147   : > { %v1757_v59 = vadd.f32 %v3725_v0, %v1689_v47  ;;  %v1494_v61 = vsub.f32 %v1430_v43, %v1247_v48  ;;  %2868 = vmatmul.msk.f32.gmra.mxu1 %vm551_vm0, %v3071_v51  ;;  %v3890_v51 = vpop.permute.xlu2 %2093 }
 0x148   : > { %3074 = vtanh.f32 %v825_v54  ;;  %v3863_v3 = vpop.f32.mrf.mxu3 }
 0x149   : > { %v2269_v5 = vmul.f32 %v3628_v26, %v1757_v59  ;;  %v1562_v7 = vmul.f32 %v3700_v53, %v1494_v61 }
 0x14b   : > { %v2333_v8 = vadd.f32 %v2269_v5, %v1821_v1  ;;  %v1626_v12 = vmul.f32 %v1562_v7, %v1562_v7  ;;  %v920_v13 = vpop.f32.mrf.mxu2  ;;  %v1432_v1 = vld [vmem:[%s3674_s15 + $0x30] sm:$0xff]  ;;  %v1590_v5 = vmul.f32 %v3700_v53, %v1522_v36  ;;  %v1459_v7 = vld [vmem:[%s3674_s15 + $0x108] sm:$0xff] }
 0x14c   : > { %v3073_v15 = vpop.eup %3072  ;;  %v921_v17 = vadd.f32 %v3842_v9, %v920_v13  ;;  %v1249_v20 = vpop.f32.mrf.mxu1  ;;  %2258 = vperm.xlu2 %2985, %v1944_v55   ;;  %v1523_v22 = vsub.f32 %v1459_v7, %v1334_v58  ;;  %v1850_v7 = vld [vmem:[#allocation2 + $0x100] sm:$0xff] }
 0x14d   : > { %2398 = vst.msk [vmem:[#allocation2 + $0x18] sm:$0xff] %vm414_vm1, %v2333_v8  ;;  %v1690_v26 = vmul.f32 0.5, %v1626_v12  ;;  %v1250_v27 = vadd.f32 %v3679_v42, %v1249_v20  ;;  %v827_v46 = vpop.f32.mrf.mxu0  ;;  %2900 = vmatmul.msk.f32.gmra.mxu3 %vm551_vm0, %v3073_v15  ;;  %v1654_v16 = vmul.f32 %v1590_v5, %v1590_v5 }
 0x14e   : > { %v3075_v29 = vpop.eup %3074  ;;  %3076 = vtanh.f32 %v921_v17  ;;  %v828_v30 = vadd.f32 %v3842_v9, %v827_v46  ;;  %v3911_v32 = vpop.permute.xlu0 %2098 }
 0x14f   : > { %v1758_v25 = vadd.f32 %v3725_v0, %v1690_v26  ;;  %v1495_v6 = vsub.f32 %v1431_v21, %v1250_v27  ;;  %2869 = vmatmul.msk.f32.gmra.mxu1 %vm551_vm0, %v3075_v29  ;;  %v3905_v21 = vpop.permute.xlu1 %2088  ;;  %v1823_v26 = vld [vmem:[#allocation2 + $0x28] sm:$0xff]  ;;  %v1718_v46 = vmul.f32 0.5, %v1654_v16  ;;  %v1824_v16 = vld [vmem:[#allocation2 + $0x30] sm:$0xff] }
 0x150   : > { %3078 = vtanh.f32 %v828_v30  ;;  %v3884_v38 = vpop.f32.mrf.mxu3 }
 0x151   : > { %v2270_v43 = vmul.f32 %v3572_v4, %v1758_v25  ;;  %v1563_v45 = vmul.f32 %v3700_v53, %v1495_v6  ;;  %v1786_v25 = vadd.f32 %v3725_v0, %v1718_v46 }
 0x153   : > { %v2334_v47 = vadd.f32 %v2270_v43, %v1822_v37  ;;  %v1627_v48 = vmul.f32 %v1563_v45, %v1563_v45  ;;  %v923_v49 = vpop.f32.mrf.mxu2  ;;  %v2109_v43 = vpop.permute.xlu2 %2108 }
 0x154   : > { %v3077_v54 = vpop.eup %3076  ;;  %v924_v59 = vadd.f32 %v3842_v9, %v923_v49  ;;  %v1252_v61 = vpop.f32.mrf.mxu1  ;;  %v2298_v58 = vmul.f32 %v2109_v43, %v1786_v25 }
 0x155   : > { %2399 = vst.msk [vmem:[#allocation2 + $0x20] sm:$0xff] %vm414_vm1, %v2334_v47  ;;  %v1691_v4 = vmul.f32 0.5, %v1627_v48  ;;  %v1253_v8 = vadd.f32 %v3679_v42, %v1252_v61  ;;  %v830_v12 = vpop.f32.mrf.mxu0  ;;  %2901 = vmatmul.msk.f32.gmra.mxu3 %vm551_vm0, %v3077_v54  ;;  %v1337_v47 = vadd.f32 %v3679_v42, %v3825_v28  ;;  %v1433_v54 = vld [vmem:[%s3674_s15 + $0x38] sm:$0xff] }
 0x156   : > { %v3079_v13 = vpop.eup %3078  ;;  %3080 = vtanh.f32 %v924_v59  ;;  %v831_v15 = vadd.f32 %v3842_v9, %v830_v12  ;;  %v1460_v59 = vld [vmem:[%s3674_s15 + $0x110] sm:$0xff] }
 0x157   : > { %v1759_v17 = vadd.f32 %v3725_v0, %v1691_v4  ;;  %v1496_v20 = vsub.f32 %v1432_v1, %v1253_v8  ;;  %2870 = vmatmul.msk.f32.gmra.mxu1 %vm551_vm0, %v3079_v13  ;;  %v2362_v8 = vadd.f32 %v2298_v58, %v1850_v7  ;;  %v1524_v55 = vsub.f32 %v1460_v59, %v1337_v47  ;;  %v3931_v46 = vpop.permute.xlu1 %2103  ;;  %v1434_v47 = vld [vmem:[%s3674_s15 + $0x40] sm:$0xff]  ;;  %v1851_v59 = vld [vmem:[#allocation2 + $0x108] sm:$0xff] }
 0x158   : > { %3082 = vtanh.f32 %v831_v15  ;;  %v3907_v27 = vpop.f32.mrf.mxu3 }
 0x159   : > { %v2271_v29 = vmul.f32 %v3612_v18, %v1759_v17  ;;  %v1564_v30 = vmul.f32 %v3700_v53, %v1496_v20  ;;  %v1591_v18 = vmul.f32 %v3700_v53, %v1523_v22  ;;  %2427 = vst.msk [vmem:[#allocation2 + $0x100] sm:$0xff] %vm414_vm1, %v2362_v8 }
 0x15b   : > { %v2335_v6 = vadd.f32 %v2271_v29, %v1823_v26  ;;  %v1628_v36 = vmul.f32 %v1564_v30, %v1564_v30  ;;  %v926_v37 = vpop.f32.mrf.mxu2  ;;  %v1655_v15 = vmul.f32 %v1591_v18, %v1591_v18 }
 0x15c   : > { %v3081_v45 = vpop.eup %3080  ;;  %v927_v48 = vadd.f32 %v3842_v9, %v926_v37  ;;  %v1255_v49 = vpop.f32.mrf.mxu1  ;;  %v1340_v37 = vadd.f32 %v3679_v42, %v3863_v3 }
 0x15d   : > { %2400 = vst.msk [vmem:[#allocation2 + $0x28] sm:$0xff] %vm414_vm1, %v2335_v6  ;;  %v1692_v61 = vmul.f32 0.5, %v1628_v36  ;;  %v1256_v1 = vadd.f32 %v3679_v42, %v1255_v49  ;;  %v833_v5 = vpop.f32.mrf.mxu0  ;;  %2902 = vmatmul.msk.f32.gmra.mxu3 %vm551_vm0, %v3081_v45  ;;  %v1719_v26 = vmul.f32 0.5, %v1655_v15  ;;  %v1461_v49 = vld [vmem:[%s3674_s15 + $0x118] sm:$0xff] }
 0x15e   : > { %v3083_v4 = vpop.eup %3082  ;;  %3084 = vtanh.f32 %v927_v48  ;;  %v834_v28 = vadd.f32 %v3842_v9, %v833_v5  ;;  %v1592_v48 = vmul.f32 %v3700_v53, %v1524_v55  ;;  %v1825_v15 = vld [vmem:[#allocation2 + $0x38] sm:$0xff] }
 0x15f   : > { %v1760_v12 = vadd.f32 %v3725_v0, %v1692_v61  ;;  %v1497_v13 = vsub.f32 %v1433_v54, %v1256_v1  ;;  %2871 = vmatmul.msk.f32.gmra.mxu1 %vm551_vm0, %v3083_v4  ;;  %v1787_v6 = vadd.f32 %v3725_v0, %v1719_v26  ;;  %v1343_v1 = vadd.f32 %v3679_v42, %v3884_v38  ;;  %v1462_v4 = vld [vmem:[%s3674_s15 + $0x120] sm:$0xff] }
 0x160   : > { %3086 = vtanh.f32 %v834_v28  ;;  %v3926_v17 = vpop.f32.mrf.mxu3  ;;  %v1656_v7 = vmul.f32 %v1592_v48, %v1592_v48 }
 0x161   : > { %v2272_v20 = vmul.f32 %v3616_v19, %v1760_v12  ;;  %v1565_v22 = vmul.f32 %v3700_v53, %v1497_v13  ;;  %v2114_v19 = vpop.permute.xlu0 %2113  ;;  %v1525_v13 = vsub.f32 %v1461_v49, %v1340_v37 }
 0x162   : > { %v2299_v61 = vmul.f32 %v2114_v19, %v1787_v6  ;;  %v2119_v6 = vpop.permute.xlu1 %2118 }
 0x163   : > { %v2336_v29 = vadd.f32 %v2272_v20, %v1824_v16  ;;  %v1629_v30 = vmul.f32 %v1565_v22, %v1565_v22  ;;  %v929_v25 = vpop.f32.mrf.mxu2  ;;  %v1720_v16 = vmul.f32 0.5, %v1656_v7  ;;  %v1526_v22 = vsub.f32 %v1462_v4, %v1343_v1 }
 0x164   : > { %v3085_v36 = vpop.eup %3084  ;;  %v930_v43 = vadd.f32 %v3842_v9, %v929_v25  ;;  %v1258_v45 = vpop.f32.mrf.mxu1  ;;  %v2363_v12 = vadd.f32 %v2299_v61, %v1851_v59  ;;  %v1593_v19 = vmul.f32 %v3700_v53, %v1525_v13  ;;  %v1346_v4 = vadd.f32 %v3679_v42, %v3907_v27 }
 0x165   : > { %2401 = vst.msk [vmem:[#allocation2 + $0x30] sm:$0xff] %vm414_vm1, %v2336_v29  ;;  %v1693_v54 = vmul.f32 0.5, %v1629_v30  ;;  %v1259_v58 = vadd.f32 %v3679_v42, %v1258_v45  ;;  %v836_v18 = vpop.f32.mrf.mxu0  ;;  %2903 = vmatmul.msk.f32.gmra.mxu3 %vm551_vm0, %v3085_v36  ;;  %v1788_v26 = vadd.f32 %v3725_v0, %v1720_v16  ;;  %v1435_v45 = vld [vmem:[%s3674_s15 + $0x48] sm:$0xff]  ;;  %v1594_v61 = vmul.f32 %v3700_v53, %v1526_v22 }
 0x166   : > { %v3087_v3 = vpop.eup %3086  ;;  %3088 = vtanh.f32 %v930_v43  ;;  %v837_v5 = vadd.f32 %v3842_v9, %v836_v18  ;;  %2428 = vst.msk [vmem:[#allocation2 + $0x108] sm:$0xff] %vm414_vm1, %v2363_v12  ;;  %v1657_v7 = vmul.f32 %v1593_v19, %v1593_v19  ;;  %v3979_v19 = vadd.f32 %v3679_v42, %v3926_v17 }
 0x167   : > { %v1761_v28 = vadd.f32 %v3725_v0, %v1693_v54  ;;  %v1498_v8 = vsub.f32 %v1434_v47, %v1259_v58  ;;  %2872 = vmatmul.msk.f32.gmra.mxu1 %vm551_vm0, %v3087_v3  ;;  %v2300_v47 = vmul.f32 %v2119_v6, %v1788_v26  ;;  %v1852_v54 = vld [vmem:[#allocation2 + $0x110] sm:$0xff]  ;;  %v1658_v13 = vmul.f32 %v1594_v61, %v1594_v61 }
 0x168   : > { %3090 = vtanh.f32 %v837_v5  ;;  %v1351_v55 = vpop.f32.mrf.mxu3  ;;  %v1721_v22 = vmul.f32 0.5, %v1657_v7  ;;  %v1853_v7 = vld [vmem:[#allocation2 + $0x118] sm:$0xff] }
 0x169   : > { %v2273_v20 = vmul.f32 %v3665_v40, %v1761_v28  ;;  %v1566_v38 = vmul.f32 %v3700_v53, %v1498_v8  ;;  %v1352_v18 = vadd.f32 %v3679_v42, %v1351_v55  ;;  %v2364_v5 = vadd.f32 %v2300_v47, %v1852_v54  ;;  %v1826_v28 = vld [vmem:[#allocation2 + $0x40] sm:$0xff]  ;;  %v1465_v8 = vld [vmem:[%s3674_s15 + $0x138] sm:$0xff] }
 0x16a   : > { %v1789_v47 = vadd.f32 %v3725_v0, %v1721_v22  ;;  %v1854_v54 = vld [vmem:[#allocation2 + $0x120] sm:$0xff] }
 0x16b   : > { %v2337_v29 = vadd.f32 %v2273_v20, %v1825_v15  ;;  %v1630_v30 = vmul.f32 %v1566_v38, %v1566_v38  ;;  %v932_v25 = vpop.f32.mrf.mxu2  ;;  %v1463_v15 = vld [vmem:[%s3674_s15 + $0x128] sm:$0xff]  ;;  %2429 = vst.msk [vmem:[#allocation2 + $0x110] sm:$0xff] %vm414_vm1, %v2364_v5  ;;  %v1722_v38 = vmul.f32 0.5, %v1658_v13  ;;  %v1529_v27 = vsub.f32 %v1465_v8, %v1352_v18  ;;  %v1464_v8 = vld [vmem:[%s3674_s15 + $0x130] sm:$0xff] }
 0x16c   : > { %v3089_v36 = vpop.eup %3088  ;;  %v933_v37 = vadd.f32 %v3842_v9, %v932_v25  ;;  %v1261_v43 = vpop.f32.mrf.mxu1 }
 0x16d   : > { %2402 = vst.msk [vmem:[#allocation2 + $0x38] sm:$0xff] %vm414_vm1, %v2337_v29  ;;  %v1694_v40 = vmul.f32 0.5, %v1630_v30  ;;  %v1262_v48 = vadd.f32 %v3679_v42, %v1261_v43  ;;  %v839_v49 = vpop.f32.mrf.mxu0  ;;  %2904 = vmatmul.msk.f32.gmra.mxu3 %vm551_vm0, %v3089_v36  ;;  %v1466_v30 = vld [vmem:[%s3674_s15 + $0x140] sm:$0xff]  ;;  %v1527_v36 = vsub.f32 %v1463_v15, %v1346_v4 }
 0x16e   : > { %v3091_v58 = vpop.eup %3090  ;;  %3092 = vtanh.f32 %v933_v37  ;;  %v840_v59 = vadd.f32 %v3842_v9, %v839_v49 }
 0x16f   : > { %v1762_v3 = vadd.f32 %v3725_v0, %v1694_v40  ;;  %v1499_v1 = vsub.f32 %v1435_v45, %v1262_v48  ;;  %2873 = vmatmul.msk.f32.gmra.mxu1 %vm551_vm0, %v3091_v58  ;;  %v1436_v45 = vld [vmem:[%s3674_s15 + $0x50] sm:$0xff]  ;;  %v2129_v58 = vpop.permute.xlu0 %2128 }
 0x170   : > { %3094 = vtanh.f32 %v840_v59  ;;  %v1354_v12 = vpop.f32.mrf.mxu3 }
 0x171   : > { %v2274_v55 = vmul.f32 %v3647_v31, %v1762_v3  ;;  %v1567_v16 = vmul.f32 %v3700_v53, %v1499_v1  ;;  %v1355_v20 = vadd.f32 %v3679_v42, %v1354_v12  ;;  %v1790_v31 = vadd.f32 %v3725_v0, %v1722_v38  ;;  %v2124_v1 = vpop.permute.xlu2 %2123  ;;  %v1827_v12 = vld [vmem:[#allocation2 + $0x48] sm:$0xff] }
 0x172   : > { %v2301_v4 = vmul.f32 %v2124_v1, %v1789_v47  ;;  %v2134_v47 = vpop.permute.xlu1 %2133  ;;  %v1857_v1 = vld [vmem:[#allocation2 + $0x138] sm:$0xff] }
 0x173   : > { %v2338_v26 = vadd.f32 %v2274_v55, %v1826_v28  ;;  %v1631_v29 = vmul.f32 %v1567_v16, %v1567_v16  ;;  %v935_v25 = vpop.f32.mrf.mxu2  ;;  %v1530_v59 = vsub.f32 %v1466_v30, %v1355_v20  ;;  %v2302_v3 = vmul.f32 %v2129_v58, %v1790_v31 }
 0x174   : > { %v3093_v6 = vpop.eup %3092  ;;  %v936_v37 = vadd.f32 %v3842_v9, %v935_v25  ;;  %v1264_v43 = vpop.f32.mrf.mxu1  ;;  %v1597_v28 = vmul.f32 %v3700_v53, %v1529_v27  ;;  %v1595_v55 = vmul.f32 %v3700_v53, %v1527_v36  ;;  %v2365_v38 = vadd.f32 %v2301_v4, %v1853_v7  ;;  %v1828_v4 = vld [vmem:[#allocation2 + $0x50] sm:$0xff] }
 0x175   : > { %2403 = vst.msk [vmem:[#allocation2 + $0x40] sm:$0xff] %vm414_vm1, %v2338_v26  ;;  %v1695_v40 = vmul.f32 0.5, %v1631_v29  ;;  %v1265_v48 = vadd.f32 %v3679_v42, %v1264_v43  ;;  %v842_v49 = vpop.f32.mrf.mxu0  ;;  %2905 = vmatmul.msk.f32.gmra.mxu3 %vm551_vm0, %v3093_v6  ;;  %v2366_v13 = vadd.f32 %v2302_v3, %v1854_v54  ;;  %v1528_v29 = vsub.f32 %v1464_v8, %v3979_v19 }
 0x176   : > { %v3095_v18 = vpop.eup %3094  ;;  %3096 = vtanh.f32 %v936_v37  ;;  %v843_v61 = vadd.f32 %v3842_v9, %v842_v49  ;;  %v1661_v22 = vmul.f32 %v1597_v28, %v1597_v28  ;;  %v1659_v26 = vmul.f32 %v1595_v55, %v1595_v55  ;;  %2430 = vst.msk [vmem:[#allocation2 + $0x118] sm:$0xff] %vm414_vm1, %v2365_v38 }
 0x177   : > { %v1763_v17 = vadd.f32 %v3725_v0, %v1695_v40  ;;  %v1500_v5 = vsub.f32 %v1436_v45, %v1265_v48  ;;  %2874 = vmatmul.msk.f32.gmra.mxu1 %vm551_vm0, %v3095_v18  ;;  %2431 = vst.msk [vmem:[#allocation2 + $0x120] sm:$0xff] %vm414_vm1, %v2366_v13  ;;  %v1598_v30 = vmul.f32 %v3700_v53, %v1530_v59  ;;  %v1437_v45 = vld [vmem:[%s3674_s15 + $0x58] sm:$0xff]  ;;  %v1467_v48 = vld [vmem:[%s3674_s15 + $0x148] sm:$0xff]  ;;  %v1468_v13 = vld [vmem:[%s3674_s15 + $0x150] sm:$0xff] }
 0x178   : > { %3098 = vtanh.f32 %v843_v61  ;;  %v1357_v15 = vpop.f32.mrf.mxu3  ;;  %v1725_v31 = vmul.f32 0.5, %v1661_v22  ;;  %v1723_v40 = vmul.f32 0.5, %v1659_v26  ;;  %v1596_v7 = vmul.f32 %v3700_v53, %v1528_v29 }
 0x179   : > { %v2275_v16 = vmul.f32 %v3652_v34, %v1763_v17  ;;  %v1568_v20 = vmul.f32 %v3700_v53, %v1500_v5  ;;  %v1358_v36 = vadd.f32 %v3679_v42, %v1357_v15  ;;  %v2144_v17 = vpop.permute.xlu0 %2143  ;;  %v1855_v15 = vld [vmem:[#allocation2 + $0x128] sm:$0xff]  ;;  %v1662_v55 = vmul.f32 %v1598_v30, %v1598_v30 }
 0x17a   : > { %v1793_v59 = vadd.f32 %v3725_v0, %v1725_v31  ;;  %v1791_v5 = vadd.f32 %v3725_v0, %v1723_v40  ;;  %v1438_v31 = vld [vmem:[%s3674_s15 + $0x60] sm:$0xff]  ;;  %v2139_v40 = vpop.permute.xlu2 %2138 }
 0x17b   : > { %v2339_v27 = vadd.f32 %v2275_v16, %v1827_v12  ;;  %v1632_v25 = vmul.f32 %v1568_v20, %v1568_v20  ;;  %v938_v6 = vpop.f32.mrf.mxu2  ;;  %v1531_v28 = vsub.f32 %v1467_v48, %v1358_v36 }
 0x17c   : > { %v3097_v37 = vpop.eup %3096  ;;  %v939_v34 = vadd.f32 %v3842_v9, %v938_v6  ;;  %v1267_v43 = vpop.f32.mrf.mxu1  ;;  %v2305_v8 = vmul.f32 %v2144_v17, %v1793_v59  ;;  %v2303_v22 = vmul.f32 %v2134_v47, %v1791_v5  ;;  %v1856_v5 = vld [vmem:[#allocation2 + $0x130] sm:$0xff] }
 0x17d   : > { %2404 = vst.msk [vmem:[#allocation2 + $0x48] sm:$0xff] %vm414_vm1, %v2339_v27  ;;  %v1696_v19 = vmul.f32 0.5, %v1632_v25  ;;  %v1268_v49 = vadd.f32 %v3679_v42, %v1267_v43  ;;  %v845_v54 = vpop.f32.mrf.mxu0  ;;  %2906 = vmatmul.msk.f32.gmra.mxu3 %vm551_vm0, %v3097_v37  ;;  %v1660_v27 = vmul.f32 %v1596_v7, %v1596_v7  ;;  %v1726_v25 = vmul.f32 0.5, %v1662_v55 }
 0x17e   : > { %v3099_v58 = vpop.eup %3098  ;;  %3100 = vtanh.f32 %v939_v34  ;;  %v846_v18 = vadd.f32 %v3842_v9, %v845_v54  ;;  %v2369_v26 = vadd.f32 %v2305_v8, %v1857_v1  ;;  %v2367_v34 = vadd.f32 %v2303_v22, %v1855_v15  ;;  %v1829_v8 = vld [vmem:[#allocation2 + $0x58] sm:$0xff] }
 0x17f   : > { %v1764_v61 = vadd.f32 %v3725_v0, %v1696_v19  ;;  %v1501_v3 = vsub.f32 %v1437_v45, %v1268_v49  ;;  %2875 = vmatmul.msk.f32.gmra.mxu1 %vm551_vm0, %v3099_v58  ;;  %v1599_v45 = vmul.f32 %v3700_v53, %v1531_v28  ;;  %v1724_v19 = vmul.f32 0.5, %v1660_v27  ;;  %v1469_v15 = vld [vmem:[%s3674_s15 + $0x158] sm:$0xff] }
 0x180   : > { %3102 = vtanh.f32 %v846_v18  ;;  %v1360_v12 = vpop.f32.mrf.mxu3  ;;  %2434 = vst.msk [vmem:[#allocation2 + $0x138] sm:$0xff] %vm414_vm1, %v2369_v26  ;;  %v1794_v47 = vadd.f32 %v3725_v0, %v1726_v25 }
 0x181   : > { %v2276_v16 = vmul.f32 %v3712_v60, %v1764_v61  ;;  %v1569_v20 = vmul.f32 %v3700_v53, %v1501_v3  ;;  %v1361_v38 = vadd.f32 %v3679_v42, %v1360_v12  ;;  %2432 = vst.msk [vmem:[#allocation2 + $0x128] sm:$0xff] %vm414_vm1, %v2367_v34  ;;  %v1792_v61 = vadd.f32 %v3725_v0, %v1724_v19  ;;  %v2149_v3 = vpop.permute.xlu1 %2148 }
 0x182   : > { %v2306_v28 = vmul.f32 %v2149_v3, %v1794_v47  ;;  %v1663_v55 = vmul.f32 %v1599_v45, %v1599_v45  ;;  %v1860_v45 = vld [vmem:[#allocation2 + $0x150] sm:$0xff]  ;;  %v1439_v47 = vld [vmem:[%s3674_s15 + $0x68] sm:$0xff] }
 0x183   : > { %v2340_v29 = vadd.f32 %v2276_v16, %v1828_v4  ;;  %v1633_v6 = vmul.f32 %v1569_v20, %v1569_v20  ;;  %v1532_v37 = vsub.f32 %v1468_v13, %v1361_v38  ;;  %v941_v36 = vpop.f32.mrf.mxu2  ;;  %v1858_v4 = vld [vmem:[#allocation2 + $0x140] sm:$0xff]  ;;  %v2304_v12 = vmul.f32 %v2139_v40, %v1792_v61 }
 0x184   : > { %v3101_v43 = vpop.eup %3100  ;;  %v942_v60 = vadd.f32 %v3842_v9, %v941_v36  ;;  %v1270_v30 = vpop.f32.mrf.mxu1  ;;  %v2370_v27 = vadd.f32 %v2306_v28, %v1858_v4  ;;  %v1727_v25 = vmul.f32 0.5, %v1663_v55  ;;  %v1470_v4 = vld [vmem:[%s3674_s15 + $0x160] sm:$0xff] }
 0x185   : > { %2405 = vst.msk [vmem:[#allocation2 + $0x50] sm:$0xff] %vm414_vm1, %v2340_v29  ;;  %v1697_v48 = vmul.f32 0.5, %v1633_v6  ;;  %v1600_v49 = vmul.f32 %v3700_v53, %v1532_v37  ;;  %v1271_v54 = vadd.f32 %v3679_v42, %v1270_v30  ;;  %v848_v58 = vpop.f32.mrf.mxu0  ;;  %2907 = vmatmul.msk.f32.gmra.mxu3 %vm551_vm0, %v3101_v43  ;;  %v2368_v26 = vadd.f32 %v2304_v12, %v1856_v5 }
 0x186   : > { %v3103_v18 = vpop.eup %3102  ;;  %3104 = vtanh.f32 %v942_v60  ;;  %v849_v59 = vadd.f32 %v3842_v9, %v848_v58  ;;  %2435 = vst.msk [vmem:[#allocation2 + $0x140] sm:$0xff] %vm414_vm1, %v2370_v27  ;;  %v4064_v27 = vld [vmem:[%s4409_s8] ss:$0 sm:$0xff] }
 0x187   : > { %v1765_v1 = vadd.f32 %v3725_v0, %v1697_v48  ;;  %v1502_v17 = vsub.f32 %v1438_v31, %v1271_v54  ;;  %2876 = vmatmul.msk.f32.gmra.mxu1 %vm551_vm0, %v3103_v18  ;;  %v1664_v7 = vmul.f32 %v1600_v49, %v1600_v49  ;;  %2433 = vst.msk [vmem:[#allocation2 + $0x130] sm:$0xff] %vm414_vm1, %v2368_v26  ;;  %v4043_v54 = vld [vmem:[%s4407_s6] ss:$0 sm:$0xff]  ;;  %v1859_v18 = vld [vmem:[#allocation2 + $0x148] sm:$0xff] }
 0x188   : > { %3106 = vtanh.f32 %v849_v59  ;;  %v1363_v13 = vpop.f32.mrf.mxu3  ;;  %v2154_v59 = vpop.permute.xlu2 %2153 }
 0x189   : > { %v2277_v16 = vmul.f32 %v3687_v44, %v1765_v1  ;;  %v1570_v20 = vmul.f32 %v3700_v53, %v1502_v17  ;;  %v1728_v38 = vmul.f32 0.5, %v1664_v7  ;;  %v1364_v22 = vadd.f32 %v3679_v42, %v1363_v13  ;;  %v2159_v44 = vpop.permute.xlu0 %2158  ;;  %v1830_v17 = vld [vmem:[#allocation2 + $0x60] sm:$0xff] }
 0x18a   : > { %v1795_v42 = vadd.f32 %v3725_v0, %v1727_v25  ;;  %v4056_v13 = vld [vmem:[%s4408_s7] ss:$0 sm:$0xff] }
 0x18b   : > { %v2341_v29 = vadd.f32 %v2277_v16, %v1829_v8  ;;  %v1634_v6 = vmul.f32 %v1570_v20, %v1570_v20  ;;  %v1796_v37 = vadd.f32 %v3725_v0, %v1728_v38  ;;  %v1533_v36 = vsub.f32 %v1469_v15, %v1364_v22  ;;  %v944_v34 = vpop.f32.mrf.mxu2 }
 0x18c   : > { %v3105_v43 = vpop.eup %3104  ;;  %v945_v60 = vadd.f32 %v3842_v9, %v944_v34  ;;  %v1273_v30 = vpop.f32.mrf.mxu1  ;;  %v2307_v1 = vmul.f32 %v2154_v59, %v1795_v42 }
 0x18d   : > { %2406 = vst.msk [vmem:[#allocation2 + $0x58] sm:$0xff] %vm414_vm1, %v2341_v29  ;;  %v1698_v31 = vmul.f32 0.5, %v1634_v6  ;;  %v2308_v40 = vmul.f32 %v2159_v44, %v1796_v37  ;;  %v1601_v19 = vmul.f32 %v3700_v53, %v1533_v36  ;;  %v851_v48 = vpop.f32.mrf.mxu0  ;;  %2908 = vmatmul.msk.f32.gmra.mxu3 %vm551_vm0, %v3105_v43  ;;  %v1274_v58 = vadd.f32 %v4043_v54, %v1273_v30  ;;  %v1440_v6 = vld [vmem:[%s3674_s15 + $0x70] sm:$0xff]  ;;  %v2164_v44 = vpop.permute.xlu1 %2163 }
 0x18e   : > { %v3107_v49 = vpop.eup %3106  ;;  %3108 = vtanh.f32 %v945_v60  ;;  %v852_v3 = vadd.f32 %v3842_v9, %v851_v48  ;;  %v2371_v12 = vadd.f32 %v2307_v1, %v1859_v18  ;;  %v1831_v48 = vld [vmem:[#allocation2 + $0x68] sm:$0xff] }
 0x18f   : > { %v1766_v53 = vadd.f32 %v3725_v0, %v1698_v31  ;;  %v2372_v61 = vadd.f32 %v2308_v40, %v1860_v45  ;;  %2877 = vmatmul.msk.f32.gmra.mxu1 %vm551_vm0, %v3107_v49  ;;  %v1503_v5 = vsub.f32 %v1439_v47, %v1274_v58  ;;  %v1665_v28 = vmul.f32 %v1601_v19, %v1601_v19  ;;  %v1861_v45 = vld [vmem:[#allocation2 + $0x158] sm:$0xff]  ;;  %v1471_v18 = vld [vmem:[%s3674_s15 + $0x168] sm:$0xff] }
 0x190   : > { %v1366_v7 = vpop.f32.mrf.mxu3  ;;  %3110 = vtanh.f32 %v852_v3  ;;  %2436 = vst.msk [vmem:[#allocation2 + $0x148] sm:$0xff] %vm414_vm1, %v2371_v12  ;;  %v1441_v12 = vld [vmem:[%s3674_s15 + $0x78] sm:$0xff] }
 0x191   : > { %v2278_v8 = vmul.f32 %v3693_v50, %v1766_v53  ;;  %2437 = vst.msk [vmem:[#allocation2 + $0x150] sm:$0xff] %vm414_vm1, %v2372_v61  ;;  %v1367_v0 = vadd.f32 %v4043_v54, %v1366_v7  ;;  %v1571_v15 = vmul.f32 %v4056_v13, %v1503_v5  ;;  %v1729_v55 = vmul.f32 0.5, %v1665_v28 }
 0x193   : > { %v2342_v16 = vadd.f32 %v2278_v8, %v1830_v17  ;;  %v1534_v20 = vsub.f32 %v1470_v4, %v1367_v0  ;;  %v947_v50 = vpop.f32.mrf.mxu2  ;;  %v1635_v22 = vmul.f32 %v1571_v15, %v1571_v15  ;;  %v1797_v25 = vadd.f32 %v4064_v27, %v1729_v55  ;;  %v1862_v15 = vld [vmem:[#allocation2 + $0x160] sm:$0xff] }
 0x194   : > { %v3109_v38 = vpop.eup %3108  ;;  %v948_v26 = vadd.f32 %v3842_v9, %v947_v50  ;;  %v1276_v29 = vpop.f32.mrf.mxu1 }
 0x195   : > { %2407 = vst.msk [vmem:[#allocation2 + $0x60] sm:$0xff] %vm414_vm1, %v2342_v16  ;;  %v1602_v37 = vmul.f32 %v4056_v13, %v1534_v20  ;;  %v1277_v36 = vadd.f32 %v4043_v54, %v1276_v29  ;;  %v854_v34 = vpop.f32.mrf.mxu0  ;;  %2909 = vmatmul.msk.f32.gmra.mxu3 %vm551_vm0, %v3109_v38  ;;  %v1699_v43 = vmul.f32 0.5, %v1635_v22  ;;  %v2309_v30 = vmul.f32 %v2164_v44, %v1797_v25  ;;  %v1832_v22 = vld [vmem:[#allocation2 + $0x70] sm:$0xff] }
 0x196   : > { %3112 = vtanh.f32 %v948_v26  ;;  %v3111_v60 = vpop.eup %3110  ;;  %v855_v31 = vadd.f32 %v3842_v9, %v854_v34 }
 0x197   : > { %v1504_v42 = vsub.f32 %v1440_v6, %v1277_v36  ;;  %v1666_v40 = vmul.f32 %v1602_v37, %v1602_v37  ;;  %v1767_v19 = vadd.f32 %v4064_v27, %v1699_v43  ;;  %2878 = vmatmul.msk.f32.gmra.mxu1 %vm551_vm0, %v3111_v60  ;;  %v2373_v49 = vadd.f32 %v2309_v30, %v1861_v45  ;;  %v1472_v6 = vld [vmem:[%s3674_s15 + $0x170] sm:$0xff] }
 0x198   : > { %v1369_v47 = vpop.f32.mrf.mxu3  ;;  %3114 = vtanh.f32 %v855_v31 }
 0x199   : > { %v1572_v58 = vmul.f32 %v4056_v13, %v1504_v42  ;;  %v2279_v59 = vmul.f32 %v3750_v23, %v1767_v19  ;;  %v1730_v53 = vmul.f32 0.5, %v1666_v40  ;;  %v1370_v61 = vadd.f32 %v4043_v54, %v1369_v47  ;;  %2438 = vst.msk [vmem:[#allocation2 + $0x158] sm:$0xff] %vm414_vm1, %v2373_v49  ;;  %v2169_v23 = vpop.permute.xlu2 %2168  ;;  %v1442_v40 = vld [vmem:[%s3674_s15 + $0x80] sm:$0xff]  ;;  %v2174_v19 = vpop.permute.xlu0 %2173 }
 0x19b   : > { %v1636_v3 = vmul.f32 %v1572_v58, %v1572_v58  ;;  %v950_v1 = vpop.f32.mrf.mxu2  ;;  %v2343_v5 = vadd.f32 %v2279_v59, %v1831_v48  ;;  %v1798_v7 = vadd.f32 %v4064_v27, %v1730_v53  ;;  %v1535_v4 = vsub.f32 %v1471_v18, %v1370_v61 }
 0x19c   : > { %v3113_v17 = vpop.eup %3112  ;;  %v951_v28 = vadd.f32 %v3842_v9, %v950_v1  ;;  %v1279_v8 = vpop.f32.mrf.mxu1 }
 0x19d   : > { %v1700_v0 = vmul.f32 0.5, %v1636_v3  ;;  %v1280_v55 = vadd.f32 %v4043_v54, %v1279_v8  ;;  %2910 = vmatmul.msk.f32.gmra.mxu3 %vm551_vm0, %v3113_v17  ;;  %2408 = vst.msk [vmem:[#allocation2 + $0x68] sm:$0xff] %vm414_vm1, %v2343_v5  ;;  %v2310_v16 = vmul.f32 %v2169_v23, %v1798_v7  ;;  %v1603_v20 = vmul.f32 %v4056_v13, %v1535_v4  ;;  %v1833_v3 = vld [vmem:[#allocation2 + $0x78] sm:$0xff]  ;;  %v2179_v23 = vpop.permute.xlu1 %2178 }
 0x19e   : > { %3116 = vtanh.f32 %v951_v28  ;;  %v3115_v50 = vpop.eup %3114  ;;  %v1473_v17 = vld [vmem:[%s3674_s15 + $0x178] sm:$0xff] }
 0x19f   : > { %v1768_v38 = vadd.f32 %v4064_v27, %v1700_v0  ;;  %v1505_v9 = vsub.f32 %v1441_v12, %v1280_v55  ;;  %v2374_v26 = vadd.f32 %v2310_v16, %v1862_v15  ;;  %v1667_v25 = vmul.f32 %v1603_v20, %v1603_v20  ;;  %2879 = vmatmul.msk.f32.gmra.mxu1 %vm551_vm0, %v3115_v50  ;;  %v1864_v55 = vld [vmem:[#allocation2 + $0x170] sm:$0xff] }
 0x1a0   : > { %v1372_v29 = vpop.f32.mrf.mxu3 }
 0x1a1   : > { %v2280_v37 = vmul.f32 %v3729_v2, %v1768_v38  ;;  %v1573_v36 = vmul.f32 %v4056_v13, %v1505_v9  ;;  %v1373_v34 = vadd.f32 %v4043_v54, %v1372_v29  ;;  %2439 = vst.msk [vmem:[#allocation2 + $0x160] sm:$0xff] %vm414_vm1, %v2374_v26  ;;  %v1731_v43 = vmul.f32 0.5, %v1667_v25  ;;  %v1863_v2 = vld [vmem:[#allocation2 + $0x168] sm:$0xff]  ;;  %v1834_v29 = vld [vmem:[#allocation2 + $0x80] sm:$0xff] }
 0x1a2   : > { %v1443_v38 = vld [vmem:[%s3674_s15 + $0x88] sm:$0xff] }
 0x1a3   : > { %v2344_v45 = vadd.f32 %v2280_v37, %v1832_v22  ;;  %v1637_v44 = vmul.f32 %v1573_v36, %v1573_v36  ;;  %v1536_v60 = vsub.f32 %v1472_v6, %v1373_v34  ;;  %v1799_v42 = vadd.f32 %v4064_v27, %v1731_v43  ;;  %v1474_v36 = vld [vmem:[%s3674_s15 + $0x180] sm:$0xff] }
 0x1a4   : > { %v3117_v30 = vpop.eup %3116  ;;  %v1282_v31 = vpop.f32.mrf.mxu1 }
 0x1a5   : > { %2409 = vst.msk [vmem:[#allocation2 + $0x70] sm:$0xff] %vm414_vm1, %v2344_v45  ;;  %v1701_v47 = vmul.f32 0.5, %v1637_v44  ;;  %v1604_v48 = vmul.f32 %v4056_v13, %v1536_v60  ;;  %v1283_v49 = vadd.f32 %v4043_v54, %v1282_v31  ;;  %2911 = vmatmul.msk.f32.gmra.mxu3 %vm551_vm0, %v3117_v30  ;;  %v2311_v58 = vmul.f32 %v2174_v19, %v1799_v42  ;;  %v2184_v31 = vpop.permute.xlu2 %2183 }
 0x1a7   : > { %v1769_v18 = vadd.f32 %v4064_v27, %v1701_v47  ;;  %v1668_v59 = vmul.f32 %v1604_v48, %v1604_v48  ;;  %v1506_v53 = vsub.f32 %v1442_v40, %v1283_v49  ;;  %v2375_v61 = vadd.f32 %v2311_v58, %v1863_v2  ;;  %v1865_v40 = vld [vmem:[#allocation2 + $0x178] sm:$0xff]  ;;  %v1444_v47 = vld [vmem:[%s3674_s15 + $0x90] sm:$0xff] }
 0x1a8   : > { %v1375_v1 = vpop.f32.mrf.mxu3 }
 0x1a9   : > { %v2281_v5 = vmul.f32 %v3735_v11, %v1769_v18  ;;  %v1732_v7 = vmul.f32 0.5, %v1668_v59  ;;  %v1574_v4 = vmul.f32 %v4056_v13, %v1506_v53  ;;  %v1376_v28 = vadd.f32 %v4043_v54, %v1375_v1  ;;  %2440 = vst.msk [vmem:[#allocation2 + $0x168] sm:$0xff] %vm414_vm1, %v2375_v61  ;;  %v1475_v1 = vld [vmem:[%s3674_s15 + $0x188] sm:$0xff] }
 0x1ab   : > { %v2345_v8 = vadd.f32 %v2281_v5, %v1833_v3  ;;  %v1800_v12 = vadd.f32 %v4064_v27, %v1732_v7  ;;  %v1638_v0 = vmul.f32 %v1574_v4, %v1574_v4  ;;  %v1537_v15 = vsub.f32 %v1473_v17, %v1376_v28  ;;  %v1835_v17 = vld [vmem:[#allocation2 + $0x88] sm:$0xff] }
 0x1ac   : > { %v1285_v16 = vpop.f32.mrf.mxu1 }
 0x1ad   : > { %2410 = vst.msk [vmem:[#allocation2 + $0x78] sm:$0xff] %vm414_vm1, %v2345_v8  ;;  %v2312_v11 = vmul.f32 %v2179_v23, %v1800_v12  ;;  %v1702_v20 = vmul.f32 0.5, %v1638_v0  ;;  %v1605_v50 = vmul.f32 %v4056_v13, %v1537_v15  ;;  %v1286_v9 = vadd.f32 %v4043_v54, %v1285_v16  ;;  %v2189_v15 = vpop.permute.xlu0 %2188 }
 0x1af   : > { %v2376_v22 = vadd.f32 %v2312_v11, %v1864_v55  ;;  %v1770_v26 = vadd.f32 %v4064_v27, %v1702_v20  ;;  %v1669_v25 = vmul.f32 %v1605_v50, %v1605_v50  ;;  %v1507_v6 = vsub.f32 %v1443_v38, %v1286_v9  ;;  %v1866_v55 = vld [vmem:[#allocation2 + $0x180] sm:$0xff]  ;;  %v1445_v38 = vld [vmem:[%s3674_s15 + $0x98] sm:$0xff] }
 0x1b0   : > { %v1378_v37 = vpop.f32.mrf.mxu3 }
 0x1b1   : > { %2441 = vst.msk [vmem:[#allocation2 + $0x170] sm:$0xff] %vm414_vm1, %v2376_v22  ;;  %v2282_v34 = vmul.f32 %v3784_v52, %v1770_v26  ;;  %v1733_v43 = vmul.f32 0.5, %v1669_v25  ;;  %v1379_v45 = vadd.f32 %v4043_v54, %v1378_v37  ;;  %v1575_v44 = vmul.f32 %v4056_v13, %v1507_v6  ;;  %v1836_v25 = vld [vmem:[#allocation2 + $0x90] sm:$0xff] }
 0x1b2   : > { %v1476_v37 = vld [vmem:[%s3674_s15 + $0x190] sm:$0xff] }
 0x1b3   : > { %v2346_v60 = vadd.f32 %v2282_v34, %v1834_v29  ;;  %v1801_v30 = vadd.f32 %v4064_v27, %v1733_v43  ;;  %v1538_v42 = vsub.f32 %v1474_v36, %v1379_v45  ;;  %v1639_v19 = vmul.f32 %v1575_v44, %v1575_v44 }
 0x1b4   : > { %v1288_v2 = vpop.f32.mrf.mxu1 }
 0x1b5   : > { %2411 = vst.msk [vmem:[#allocation2 + $0x80] sm:$0xff] %vm414_vm1, %v2346_v60  ;;  %v2313_v48 = vmul.f32 %v2184_v31, %v1801_v30  ;;  %v1606_v52 = vmul.f32 %v4056_v13, %v1538_v42  ;;  %v1289_v49 = vadd.f32 %v4043_v54, %v1288_v2  ;;  %v1703_v58 = vmul.f32 0.5, %v1639_v19  ;;  %v2194_v42 = vpop.permute.xlu1 %2193  ;;  %v1867_v31 = vld [vmem:[#allocation2 + $0x188] sm:$0xff]  ;;  %v1446_v2 = vld [vmem:[%s3674_s15 + $0xa0] sm:$0xff] }
 0x1b7   : > { %v2377_v18 = vadd.f32 %v2313_v48, %v1865_v40  ;;  %v1670_v59 = vmul.f32 %v1606_v52, %v1606_v52  ;;  %v1508_v53 = vsub.f32 %v1444_v47, %v1289_v49  ;;  %v1771_v61 = vadd.f32 %v4064_v27, %v1703_v58 }
 0x1b8   : > { %v1381_v3 = vpop.f32.mrf.mxu3 }
 0x1b9   : > { %2442 = vst.msk [vmem:[#allocation2 + $0x178] sm:$0xff] %vm414_vm1, %v2377_v18  ;;  %v1734_v5 = vmul.f32 0.5, %v1670_v59  ;;  %v1576_v7 = vmul.f32 %v4056_v13, %v1508_v53  ;;  %v1382_v4 = vadd.f32 %v4043_v54, %v1381_v3  ;;  %v2283_v28 = vmul.f32 %v3765_v33, %v1771_v61  ;;  %v1477_v61 = vld [vmem:[%s3674_s15 + $0x198] sm:$0xff] }
 0x1ba   : > { %v1837_v3 = vld [vmem:[#allocation2 + $0x98] sm:$0xff] }
 0x1bb   : > { %v1802_v8 = vadd.f32 %v4064_v27, %v1734_v5  ;;  %v1640_v12 = vmul.f32 %v1576_v7, %v1576_v7  ;;  %v1539_v0 = vsub.f32 %v1475_v1, %v1382_v4  ;;  %v2347_v23 = vadd.f32 %v2283_v28, %v1835_v17 }
 0x1bc   : > { %v1291_v16 = vpop.f32.mrf.mxu1 }
 0x1bd   : > { %v2314_v11 = vmul.f32 %v2189_v15, %v1802_v8  ;;  %v1704_v20 = vmul.f32 0.5, %v1640_v12  ;;  %v1607_v50 = vmul.f32 %v4056_v13, %v1539_v0  ;;  %2412 = vst.msk [vmem:[#allocation2 + $0x88] sm:$0xff] %vm414_vm1, %v2347_v23  ;;  %v1292_v9 = vadd.f32 %v4043_v54, %v1291_v16  ;;  %v2199_v12 = vpop.permute.xlu2 %2198  ;;  %v1868_v15 = vld [vmem:[#allocation2 + $0x190] sm:$0xff] }
 0x1bf   : > { %v2378_v22 = vadd.f32 %v2314_v11, %v1866_v55  ;;  %v1772_v33 = vadd.f32 %v4064_v27, %v1704_v20  ;;  %v1671_v26 = vmul.f32 %v1607_v50, %v1607_v50  ;;  %v1509_v29 = vsub.f32 %v1445_v38, %v1292_v9  ;;  %v1447_v20 = vld [vmem:[%s3674_s15 + $0xa8] sm:$0xff] }
 0x1c0   : > { %v1384_v6 = vpop.f32.mrf.mxu3 }
 0x1c1   : > { %2443 = vst.msk [vmem:[#allocation2 + $0x180] sm:$0xff] %vm414_vm1, %v2378_v22  ;;  %v2284_v36 = vmul.f32 %v3771_v39, %v1772_v33  ;;  %v1735_v34 = vmul.f32 0.5, %v1671_v26  ;;  %v1385_v43 = vadd.f32 %v4043_v54, %v1384_v6  ;;  %v1577_v45 = vmul.f32 %v4056_v13, %v1509_v29  ;;  %v1838_v22 = vld [vmem:[#allocation2 + $0xa0] sm:$0xff] }
 0x1c3   : > { %v2348_v44 = vadd.f32 %v2284_v36, %v1836_v25  ;;  %v1803_v60 = vadd.f32 %v4064_v27, %v1735_v34  ;;  %v1540_v30 = vsub.f32 %v1476_v37, %v1385_v43  ;;  %v1641_v40 = vmul.f32 %v1577_v45, %v1577_v45  ;;  %v1478_v25 = vld [vmem:[%s3674_s15 + $0x1a0] sm:$0xff] }
 0x1c4   : > { %v1294_v19 = vpop.f32.mrf.mxu1 }
 0x1c5   : > { %2413 = vst.msk [vmem:[#allocation2 + $0x90] sm:$0xff] %vm414_vm1, %v2348_v44  ;;  %v2315_v47 = vmul.f32 %v2194_v42, %v1803_v60  ;;  %v1608_v39 = vmul.f32 %v4056_v13, %v1540_v30  ;;  %v1295_v48 = vadd.f32 %v4043_v54, %v1294_v19  ;;  %v1705_v52 = vmul.f32 0.5, %v1641_v40  ;;  %v2204_v44 = vpop.permute.xlu0 %2203  ;;  %v1869_v60 = vld [vmem:[#allocation2 + $0x198] sm:$0xff] }
 0x1c7   : > { %v2379_v49 = vadd.f32 %v2315_v47, %v1867_v31  ;;  %v1672_v58 = vmul.f32 %v1608_v39, %v1608_v39  ;;  %v1510_v18 = vsub.f32 %v1446_v2, %v1295_v48  ;;  %v1773_v59 = vadd.f32 %v4064_v27, %v1705_v52  ;;  %v1448_v31 = vld [vmem:[%s3674_s15 + $0xb0] sm:$0xff] }
 0x1c8   : > { %v1387_v53 = vpop.f32.mrf.mxu3 }
 0x1c9   : > { %2444 = vst.msk [vmem:[#allocation2 + $0x188] sm:$0xff] %vm414_vm1, %v2379_v49  ;;  %v1736_v1 = vmul.f32 0.5, %v1672_v58  ;;  %v1578_v17 = vmul.f32 %v4056_v13, %v1510_v18  ;;  %v1388_v5 = vadd.f32 %v4043_v54, %v1387_v53  ;;  %v2285_v7 = vmul.f32 %v3820_v24, %v1773_v59  ;;  %v1479_v58 = vld [vmem:[%s3674_s15 + $0x1a8] sm:$0xff] }
 0x1ca   : > { %v1839_v18 = vld [vmem:[#allocation2 + $0xa8] sm:$0xff] }
 0x1cb   : > { %v1804_v4 = vadd.f32 %v4064_v27, %v1736_v1  ;;  %v1642_v28 = vmul.f32 %v1578_v17, %v1578_v17  ;;  %v1541_v8 = vsub.f32 %v1477_v61, %v1388_v5  ;;  %v2349_v0 = vadd.f32 %v2285_v7, %v1837_v3  ;;  %v2209_v7 = vpop.permute.xlu1 %2208 }
 0x1cc   : > { %v1297_v23 = vpop.f32.mrf.mxu1 }
 0x1cd   : > { %v2316_v55 = vmul.f32 %v2199_v12, %v1804_v4  ;;  %v1706_v16 = vmul.f32 0.5, %v1642_v28  ;;  %v1609_v11 = vmul.f32 %v4056_v13, %v1541_v8  ;;  %2414 = vst.msk [vmem:[#allocation2 + $0x98] sm:$0xff] %vm414_vm1, %v2349_v0  ;;  %v1298_v50 = vadd.f32 %v4043_v54, %v1297_v23  ;;  %v1870_v28 = vld [vmem:[#allocation2 + $0x1a0] sm:$0xff]  ;;  %v1449_v23 = vld [vmem:[%s3674_s15 + $0xb8] sm:$0xff] }
 0x1cf   : > { %v2380_v38 = vadd.f32 %v2316_v55, %v1868_v15  ;;  %v1774_v24 = vadd.f32 %v4064_v27, %v1706_v16  ;;  %v1673_v9 = vmul.f32 %v1609_v11, %v1609_v11  ;;  %v1511_v33 = vsub.f32 %v1447_v20, %v1298_v50  ;;  %v1840_v20 = vld [vmem:[#allocation2 + $0xb0] sm:$0xff] }
 0x1d0   : > { %v1390_v26 = vpop.f32.mrf.mxu3 }
 0x1d1   : > { %2445 = vst.msk [vmem:[#allocation2 + $0x190] sm:$0xff] %vm414_vm1, %v2380_v38  ;;  %v2286_v29 = vmul.f32 %v3798_v62, %v1774_v24  ;;  %v1737_v6 = vmul.f32 0.5, %v1673_v9  ;;  %v1391_v37 = vadd.f32 %v4043_v54, %v1390_v26  ;;  %v1579_v36 = vmul.f32 %v4056_v13, %v1511_v33  ;;  %v1480_v24 = vld [vmem:[%s3674_s15 + $0x1b0] sm:$0xff] }
 0x1d3   : > { %v2350_v34 = vadd.f32 %v2286_v29, %v1838_v22  ;;  %v1805_v43 = vadd.f32 %v4064_v27, %v1737_v6  ;;  %v1542_v45 = vsub.f32 %v1478_v25, %v1391_v37  ;;  %v1643_v30 = vmul.f32 %v1579_v36, %v1579_v36  ;;  %v2214_v37 = vpop.permute.xlu2 %2213  ;;  %v1871_v36 = vld [vmem:[#allocation2 + $0x1a8] sm:$0xff] }
 0x1d4   : > { %v1300_v42 = vpop.f32.mrf.mxu1 }
 0x1d5   : > { %2415 = vst.msk [vmem:[#allocation2 + $0xa0] sm:$0xff] %vm414_vm1, %v2350_v34  ;;  %v2317_v40 = vmul.f32 %v2204_v44, %v1805_v43  ;;  %v1610_v62 = vmul.f32 %v4056_v13, %v1542_v45  ;;  %v1301_v19 = vadd.f32 %v4043_v54, %v1300_v42  ;;  %v1707_v2 = vmul.f32 0.5, %v1643_v30  ;;  %v1450_v45 = vld [vmem:[%s3674_s15 + $0xc0] sm:$0xff] }
 0x1d7   : > { %v2381_v47 = vadd.f32 %v2317_v40, %v1869_v60  ;;  %v1674_v39 = vmul.f32 %v1610_v62, %v1610_v62  ;;  %v1512_v48 = vsub.f32 %v1448_v31, %v1301_v19  ;;  %v1775_v52 = vadd.f32 %v4064_v27, %v1707_v2  ;;  %v1481_v2 = vld [vmem:[%s3674_s15 + $0x1b8] sm:$0xff] }
 0x1d8   : > { %v1393_v49 = vpop.f32.mrf.mxu3 }
 0x1d9   : > { %2446 = vst.msk [vmem:[#allocation2 + $0x198] sm:$0xff] %vm414_vm1, %v2381_v47  ;;  %v1738_v59 = vmul.f32 0.5, %v1674_v39  ;;  %v1580_v53 = vmul.f32 %v4056_v13, %v1512_v48  ;;  %v1394_v61 = vadd.f32 %v4043_v54, %v1393_v49  ;;  %v2287_v3 = vmul.f32 %v3805_v10, %v1775_v52  ;;  %v1841_v47 = vld [vmem:[#allocation2 + $0xb8] sm:$0xff] }
 0x1db   : > { %v1806_v1 = vadd.f32 %v4064_v27, %v1738_v59  ;;  %v1644_v17 = vmul.f32 %v1580_v53, %v1580_v53  ;;  %v1543_v5 = vsub.f32 %v1479_v58, %v1394_v61  ;;  %v2351_v4 = vadd.f32 %v2287_v3, %v1839_v18  ;;  %v2219_v53 = vpop.permute.xlu0 %2218  ;;  %v1872_v3 = vld [vmem:[#allocation2 + $0x1b0] sm:$0xff] }
 0x1dc   : > { %v1303_v8 = vpop.f32.mrf.mxu1 }
 0x1dd   : > { %v2318_v12 = vmul.f32 %v2209_v7, %v1806_v1  ;;  %v1708_v0 = vmul.f32 0.5, %v1644_v17  ;;  %v1611_v15 = vmul.f32 %v4056_v13, %v1543_v5  ;;  %2416 = vst.msk [vmem:[#allocation2 + $0xa8] sm:$0xff] %vm414_vm1, %v2351_v4  ;;  %v1304_v55 = vadd.f32 %v4043_v54, %v1303_v8  ;;  %v1451_v4 = vld [vmem:[%s3674_s15 + $0xc8] sm:$0xff] }
 0x1df   : > { %v2382_v16 = vadd.f32 %v2318_v12, %v1870_v28  ;;  %v1776_v10 = vadd.f32 %v4064_v27, %v1708_v0  ;;  %v1675_v11 = vmul.f32 %v1611_v15, %v1611_v15  ;;  %v1513_v50 = vsub.f32 %v1449_v23, %v1304_v55  ;;  %v1842_v0 = vld [vmem:[#allocation2 + $0xc0] sm:$0xff] }
 0x1e0   : > { %v1396_v38 = vpop.f32.mrf.mxu3  ;;  %v1482_v55 = vld [vmem:[%s3674_s15 + $0x1c0] sm:$0xff] }
 0x1e1   : > { %2447 = vst.msk [vmem:[#allocation2 + $0x1a0] sm:$0xff] %vm414_vm1, %v2382_v16  ;;  %v2288_v9 = vmul.f32 %v3860_v63, %v1776_v10  ;;  %v1739_v22 = vmul.f32 0.5, %v1675_v11  ;;  %v1397_v33 = vadd.f32 %v4043_v54, %v1396_v38  ;;  %v1581_v26 = vmul.f32 %v4056_v13, %v1513_v50 }
 0x1e3   : > { %v2352_v25 = vadd.f32 %v2288_v9, %v1840_v20  ;;  %v1807_v29 = vadd.f32 %v4064_v27, %v1739_v22  ;;  %v1544_v6 = vsub.f32 %v1480_v24, %v1397_v33  ;;  %v1645_v34 = vmul.f32 %v1581_v26, %v1581_v26  ;;  %v2224_v9 = vpop.permute.xlu1 %2223  ;;  %v1873_v22 = vld [vmem:[#allocation2 + $0x1b8] sm:$0xff] }
 0x1e4   : > { %v1306_v43 = vpop.f32.mrf.mxu1 }
 0x1e5   : > { %2417 = vst.msk [vmem:[#allocation2 + $0xb0] sm:$0xff] %vm414_vm1, %v2352_v25  ;;  %v2319_v44 = vmul.f32 %v2214_v37, %v1807_v29  ;;  %v1612_v63 = vmul.f32 %v4056_v13, %v1544_v6  ;;  %v1307_v60 = vadd.f32 %v4043_v54, %v1306_v43  ;;  %v1709_v30 = vmul.f32 0.5, %v1645_v34  ;;  %v1452_v25 = vld [vmem:[%s3674_s15 + $0xd0] sm:$0xff]  ;;  %v2463_v29 = vld [vmem:[#allocation2 + $0x8] sm:$0xff]  ;;  %v2462_v34 = vld [vmem:[#allocation2] sm:$0xff] }
 0x1e6   : > { %v2464_v43 = vld [vmem:[#allocation2 + $0x10] sm:$0xff] }
 0x1e7   : > { %v2383_v42 = vadd.f32 %v2319_v44, %v1871_v36  ;;  %v1676_v31 = vmul.f32 %v1612_v63, %v1612_v63  ;;  %v1514_v40 = vsub.f32 %v1450_v45, %v1307_v60  ;;  %v1777_v62 = vadd.f32 %v4064_v27, %v1709_v30 }
 0x1e8   : > { %v1399_v19 = vpop.f32.mrf.mxu3  ;;  %v2527_v60 = vsel %vm414_vm1, %v2463_v29, 0.0 }
 0x1e9   : > { %2448 = vst.msk [vmem:[#allocation2 + $0x1a8] sm:$0xff] %vm414_vm1, %v2383_v42  ;;  %v1740_v39 = vmul.f32 0.5, %v1676_v31  ;;  %v1582_v48 = vmul.f32 %v4056_v13, %v1514_v40  ;;  %v1400_v52 = vadd.f32 %v4043_v54, %v1399_v19  ;;  %v2289_v49 = vmul.f32 %v3835_v56, %v1777_v62  ;;  %v1483_v31 = vld [vmem:[%s3674_s15 + $0x1c8] sm:$0xff]  ;;  %v2465_v40 = vld [vmem:[#allocation2 + $0x18] sm:$0xff] }
 0x1ea   : > { %v1843_v62 = vld [vmem:[#allocation2 + $0xc8] sm:$0xff] }
 0x1eb   : > { %v1808_v58 = vadd.f32 %v4064_v27, %v1740_v39  ;;  %v1646_v18 = vmul.f32 %v1582_v48, %v1582_v48  ;;  %v1545_v59 = vsub.f32 %v1481_v2, %v1400_v52  ;;  %v2353_v61 = vadd.f32 %v2289_v49, %v1841_v47 }
 0x1ec   : > { %v1309_v1 = vpop.f32.mrf.mxu1  ;;  %v2526_v39 = vsel %vm414_vm1, %v2462_v34, 0.0  ;;  %v2529_v48 = vsel %vm414_vm1, %v2464_v43, 0.0 }
 0x1ed   : > { %v2320_v17 = vmul.f32 %v2219_v53, %v1808_v58  ;;  %v1710_v5 = vmul.f32 0.5, %v1646_v18  ;;  %v1613_v7 = vmul.f32 %v4056_v13, %v1545_v59  ;;  %2418 = vst.msk [vmem:[#allocation2 + $0xb8] sm:$0xff] %vm414_vm1, %v2353_v61  ;;  %v1310_v28 = vadd.f32 %v4043_v54, %v1309_v1  ;;  %v2466_v58 = vld [vmem:[#allocation2 + $0x20] sm:$0xff] }
 0x1ee   : > { %v2528_v49 = vadd.f32 %v2527_v60, %v2526_v39  ;;  %v2531_v61 = vsel %vm414_vm1, %v2465_v40, 0.0 }
 0x1ef   : > { %v2384_v8 = vadd.f32 %v2320_v17, %v1872_v3  ;;  %v1778_v56 = vadd.f32 %v4064_v27, %v1710_v5  ;;  %v1677_v12 = vmul.f32 %v1613_v7, %v1613_v7  ;;  %v1515_v15 = vsub.f32 %v1451_v4, %v1310_v28  ;;  %v2229_v3 = vpop.permute.xlu2 %2228  ;;  %v1874_v17 = vld [vmem:[#allocation2 + $0x1c0] sm:$0xff]  ;;  %v2467_v4 = vld [vmem:[#allocation2 + $0x28] sm:$0xff] }
 0x1f0   : > { %v1402_v23 = vpop.f32.mrf.mxu3  ;;  %v2530_v7 = vadd.f32 %v2529_v48, %v2528_v49  ;;  %v2472_v48 = vld [vmem:[#allocation2 + $0x50] sm:$0xff] }
 0x1f1   : > { %2449 = vst.msk [vmem:[#allocation2 + $0x1b0] sm:$0xff] %vm414_vm1, %v2384_v8  ;;  %v2290_v16 = vmul.f32 %v3853_v57, %v1778_v56  ;;  %v1741_v10 = vmul.f32 0.5, %v1677_v12  ;;  %v1403_v11 = vadd.f32 %v4043_v54, %v1402_v23  ;;  %v1583_v20 = vmul.f32 %v4056_v13, %v1515_v15  ;;  %v1453_v56 = vld [vmem:[%s3674_s15 + $0xd8] sm:$0xff]  ;;  %v2468_v23 = vld [vmem:[#allocation2 + $0x30] sm:$0xff] }
 0x1f2   : > { %v2533_v12 = vsel %vm414_vm1, %v2466_v58, 0.0  ;;  %v2532_v15 = vadd.f32 %v2531_v61, %v2530_v7  ;;  %v2537_v29 = vsel %vm414_vm1, %v2468_v23, 0.0  ;;  %v1485_v61 = vld [vmem:[%s3674_s15 + $0x1d8] sm:$0xff] }
 0x1f3   : > { %v2354_v50 = vadd.f32 %v2290_v16, %v1842_v0  ;;  %v1809_v38 = vadd.f32 %v4064_v27, %v1741_v10  ;;  %v1546_v24 = vsub.f32 %v1482_v55, %v1403_v11  ;;  %v1647_v33 = vmul.f32 %v1583_v20, %v1583_v20  ;;  %v1844_v20 = vld [vmem:[#allocation2 + $0xd0] sm:$0xff] }
 0x1f4   : > { %v1312_v26 = vpop.f32.mrf.mxu1  ;;  %v2535_v11 = vsel %vm414_vm1, %v2467_v4, 0.0 }
 0x1f5   : > { %2419 = vst.msk [vmem:[#allocation2 + $0xc0] sm:$0xff] %vm414_vm1, %v2354_v50  ;;  %v2321_v6 = vmul.f32 %v2224_v9, %v1809_v38  ;;  %v1614_v57 = vmul.f32 %v4056_v13, %v1546_v24  ;;  %v1313_v37 = vadd.f32 %v4043_v54, %v1312_v26  ;;  %v1711_v36 = vmul.f32 0.5, %v1647_v33  ;;  %v1484_v24 = vld [vmem:[%s3674_s15 + $0x1d0] sm:$0xff] }
 0x1f6   : > { %v2534_v9 = vadd.f32 %v2533_v12, %v2532_v15 }
 0x1f7   : > { %v2385_v45 = vadd.f32 %v2321_v6, %v1873_v22  ;;  %v1678_v44 = vmul.f32 %v1614_v57, %v1614_v57  ;;  %v1516_v63 = vsub.f32 %v1452_v25, %v1313_v37  ;;  %v1779_v30 = vadd.f32 %v4064_v27, %v1711_v36  ;;  %v2469_v22 = vld [vmem:[#allocation2 + $0x38] sm:$0xff]  ;;  %v2470_v37 = vld [vmem:[#allocation2 + $0x40] sm:$0xff] }
 0x1f8   : > { %v1405_v42 = vpop.f32.mrf.mxu3  ;;  %v2536_v57 = vadd.f32 %v2535_v11, %v2534_v9  ;;  %v1455_v9 = vld [vmem:[%s3674_s15 + $0xe8] sm:$0xff] }
 0x1f9   : > { %2450 = vst.msk [vmem:[#allocation2 + $0x1b8] sm:$0xff] %vm414_vm1, %v2385_v45  ;;  %v1742_v19 = vmul.f32 0.5, %v1678_v44  ;;  %v1584_v2 = vmul.f32 %v4056_v13, %v1516_v63  ;;  %v1406_v47 = vadd.f32 %v4043_v54, %v1405_v42  ;;  %v2291_v52 = vmul.f32 %v3882_v35, %v1779_v30  ;;  %v2234_v44 = vpop.permute.xlu0 %2233  ;;  %v1875_v63 = vld [vmem:[#allocation2 + $0x1c8] sm:$0xff] }
 0x1fa   : > { %v2539_v45 = vsel %vm414_vm1, %v2469_v22, 0.0  ;;  %v2538_v42 = vadd.f32 %v2537_v29, %v2536_v57 }
 0x1fb   : > { %v1810_v18 = vadd.f32 %v4064_v27, %v1742_v19  ;;  %v1648_v59 = vmul.f32 %v1584_v2, %v1584_v2  ;;  %v1547_v53 = vsub.f32 %v1483_v31, %v1406_v47  ;;  %v2355_v1 = vadd.f32 %v2291_v52, %v1843_v62  ;;  %v2471_v31 = vld [vmem:[#allocation2 + $0x48] sm:$0xff] }
 0x1fc   : > { %v1315_v5 = vpop.f32.mrf.mxu1  ;;  %v2541_v2 = vsel %vm414_vm1, %v2470_v37, 0.0  ;;  %v2540_v39 = vadd.f32 %v2539_v45, %v2538_v42  ;;  %v1486_v45 = vld [vmem:[%s3674_s15 + $0x1e0] sm:$0xff] }
 0x1fd   : > { %v2322_v28 = vmul.f32 %v2229_v3, %v1810_v18  ;;  %v1712_v8 = vmul.f32 0.5, %v1648_v59  ;;  %v1615_v35 = vmul.f32 %v4056_v13, %v1547_v53  ;;  %2420 = vst.msk [vmem:[#allocation2 + $0xc8] sm:$0xff] %vm414_vm1, %v2355_v1  ;;  %v1316_v0 = vadd.f32 %v4043_v54, %v1315_v5  ;;  %v2473_v1 = vld [vmem:[#allocation2 + $0x58] sm:$0xff] }
 0x1fe   : > { %v2543_v18 = vsel %vm414_vm1, %v2471_v31, 0.0  ;;  %v2542_v3 = vadd.f32 %v2541_v2, %v2540_v39  ;;  %v2547_v23 = vsel %vm414_vm1, %v2473_v1, 0.0 }
 0x1ff   : > { %v2386_v55 = vadd.f32 %v2322_v28, %v1874_v17  ;;  %v1780_v16 = vadd.f32 %v4064_v27, %v1712_v8  ;;  %v1679_v10 = vmul.f32 %v1615_v35, %v1615_v35  ;;  %v1517_v50 = vsub.f32 %v1453_v56, %v1316_v0  ;;  %v1845_v17 = vld [vmem:[#allocation2 + $0xd8] sm:$0xff]  ;;  %v2474_v56 = vld [vmem:[#allocation2 + $0x60] sm:$0xff] }
 0x200   : > { %v1408_v38 = vpop.f32.mrf.mxu3  ;;  %v2545_v28 = vsel %vm414_vm1, %v2472_v48, 0.0  ;;  %v2544_v35 = vadd.f32 %v2543_v18, %v2542_v3  ;;  %v2549_v22 = vsel %vm414_vm1, %v2474_v56, 0.0  ;;  %v2244_v48 = vpop.permute.xlu2 %2243 }
 0x201   : > { %2451 = vst.msk [vmem:[#allocation2 + $0x1c0] sm:$0xff] %vm414_vm1, %v2386_v55  ;;  %v2292_v33 = vmul.f32 %v3868_v14, %v1780_v16  ;;  %v1743_v26 = vmul.f32 0.5, %v1679_v10  ;;  %v1409_v25 = vadd.f32 %v4043_v54, %v1408_v38  ;;  %v1585_v6 = vmul.f32 %v4056_v13, %v1517_v50  ;;  %v1454_v14 = vld [vmem:[%s3674_s15 + $0xe0] sm:$0xff]  ;;  %v2239_v55 = vpop.permute.xlu1 %2238  ;;  %v1876_v10 = vld [vmem:[#allocation2 + $0x1d0] sm:$0xff]  ;;  %v2475_v50 = vld [vmem:[#allocation2 + $0x68] sm:$0xff] }
 0x202   : > { %v2551_v37 = vsel %vm414_vm1, %v2475_v50, 0.0 }
 0x203   : > { %v2356_v36 = vadd.f32 %v2292_v33, %v1844_v20  ;;  %v1811_v34 = vadd.f32 %v4064_v27, %v1743_v26  ;;  %v1548_v43 = vsub.f32 %v1484_v24, %v1409_v25  ;;  %v1649_v60 = vmul.f32 %v1585_v6, %v1585_v6  ;;  %v2476_v25 = vld [vmem:[#allocation2 + $0x70] sm:$0xff] }
 0x204   : > { %v1318_v30 = vpop.f32.mrf.mxu1  ;;  %v2546_v20 = vadd.f32 %v2545_v28, %v2544_v35  ;;  %v2553_v42 = vsel %vm414_vm1, %v2476_v25, 0.0  ;;  %v1878_v25 = vld [vmem:[#allocation2 + $0x1e0] sm:$0xff] }
 0x205   : > { %2421 = vst.msk [vmem:[#allocation2 + $0xd0] sm:$0xff] %vm414_vm1, %v2356_v36  ;;  %v2323_v40 = vmul.f32 %v2234_v44, %v1811_v34  ;;  %v1616_v62 = vmul.f32 %v4056_v13, %v1548_v43  ;;  %v1319_v19 = vadd.f32 %v4043_v54, %v1318_v30  ;;  %v1713_v47 = vmul.f32 0.5, %v1649_v60  ;;  %v1846_v36 = vld [vmem:[#allocation2 + $0xe0] sm:$0xff] }
 0x206   : > { %v2548_v26 = vadd.f32 %v2547_v23, %v2546_v20  ;;  %v2481_v23 = vld [vmem:[#allocation2 + $0x98] sm:$0xff] }
 0x207   : > { %v2387_v52 = vadd.f32 %v2323_v40, %v1875_v63  ;;  %v1680_v49 = vmul.f32 %v1616_v62, %v1616_v62  ;;  %v1518_v58 = vsub.f32 %v1454_v14, %v1319_v19  ;;  %v1781_v59 = vadd.f32 %v4064_v27, %v1713_v47  ;;  %v2477_v63 = vld [vmem:[#allocation2 + $0x78] sm:$0xff]  ;;  %v2478_v62 = vld [vmem:[#allocation2 + $0x80] sm:$0xff] }
 0x208   : > { %v1411_v53 = vpop.f32.mrf.mxu3  ;;  %v2550_v44 = vadd.f32 %v2549_v22, %v2548_v26  ;;  %v2555_v39 = vsel %vm414_vm1, %v2477_v63, 0.0  ;;  %v2557_v3 = vsel %vm414_vm1, %v2478_v62, 0.0  ;;  %v2249_v22 = vpop.permute.xlu0 %2248  ;;  %v2484_v63 = vld [vmem:[#allocation2 + $0xb0] sm:$0xff] }
 0x209   : > { %2452 = vst.msk [vmem:[#allocation2 + $0x1c8] sm:$0xff] %vm414_vm1, %v2387_v52  ;;  %v1744_v5 = vmul.f32 0.5, %v1680_v49  ;;  %v1586_v7 = vmul.f32 %v4056_v13, %v1518_v58  ;;  %v1412_v4 = vadd.f32 %v4043_v54, %v1411_v53  ;;  %v2293_v8 = vmul.f32 %v3886_v41, %v1781_v59  ;;  %v1877_v52 = vld [vmem:[#allocation2 + $0x1d8] sm:$0xff]  ;;  %v2479_v58 = vld [vmem:[#allocation2 + $0x88] sm:$0xff] }
 0x20a   : > { %v2552_v40 = vadd.f32 %v2551_v37, %v2550_v44 }
 0x20b   : > { %v1812_v12 = vadd.f32 %v4064_v27, %v1744_v5  ;;  %v1650_v0 = vmul.f32 %v1586_v7, %v1586_v7  ;;  %v1549_v15 = vsub.f32 %v1485_v61, %v1412_v4  ;;  %v2357_v16 = vadd.f32 %v2293_v8, %v1845_v17  ;;  %v1456_v61 = vld [vmem:[%s3674_s15 + $0xf0] sm:$0xff] }
 0x20c   : > { %v1321_v11 = vpop.f32.mrf.mxu1  ;;  %v2480_v7 = vld [vmem:[#allocation2 + $0x90] sm:$0xff]  ;;  %v2559_v8 = vsel %vm414_vm1, %v2479_v58, 0.0 }
 0x20d   : > { %v2324_v38 = vmul.f32 %v2239_v55, %v1812_v12  ;;  %v1714_v24 = vmul.f32 0.5, %v1650_v0  ;;  %v1617_v41 = vmul.f32 %v4056_v13, %v1549_v15  ;;  %2422 = vst.msk [vmem:[#allocation2 + $0xd8] sm:$0xff] %vm414_vm1, %v2357_v16  ;;  %v1322_v33 = vadd.f32 %v4043_v54, %v1321_v11  ;;  %v1487_v0 = vld [vmem:[%s3674_s15 + $0x1e8] sm:$0xff] }
 0x20e   : > { %v1847_v55 = vld [vmem:[#allocation2 + $0xe8] sm:$0xff]  ;;  %v2561_v11 = vsel %vm414_vm1, %v2480_v7, 0.0 }
 0x20f   : > { %v2388_v29 = vadd.f32 %v2324_v38, %v1876_v10  ;;  %v1782_v6 = vadd.f32 %v4064_v27, %v1714_v24  ;;  %v1681_v57 = vmul.f32 %v1617_v41, %v1617_v41  ;;  %v1519_v34 = vsub.f32 %v1455_v9, %v1322_v33  ;;  %v2482_v24 = vld [vmem:[#allocation2 + $0xa0] sm:$0xff] }
 0x210   : > { %v1414_v43 = vpop.f32.mrf.mxu3  ;;  %v2563_v33 = vsel %vm414_vm1, %v2481_v23, 0.0 }
 0x211   : > { %2453 = vst.msk [vmem:[#allocation2 + $0x1d0] sm:$0xff] %vm414_vm1, %v2388_v29  ;;  %v2294_v60 = vmul.f32 %v3905_v21, %v1782_v6  ;;  %v1745_v30 = vmul.f32 0.5, %v1681_v57  ;;  %v1415_v14 = vadd.f32 %v4043_v54, %v1414_v43  ;;  %v1587_v31 = vmul.f32 %v4056_v13, %v1519_v34  ;;  %v2483_v57 = vld [vmem:[#allocation2 + $0xa8] sm:$0xff] }
 0x212   : > { %v2554_v21 = vadd.f32 %v2553_v42, %v2552_v40  ;;  %v2565_v34 = vsel %vm414_vm1, %v2482_v24, 0.0  ;;  %v4300_v42 = vld [vmem:[%s4409_s8] ss:$0 sm:$0xff] }
 0x213   : > { %v2358_v19 = vadd.f32 %v2294_v60, %v1846_v36  ;;  %v1813_v2 = vadd.f32 %v4064_v27, %v1745_v30  ;;  %v1550_v47 = vsub.f32 %v1486_v45, %v1415_v14  ;;  %v1651_v49 = vmul.f32 %v1587_v31, %v1587_v31 }
 0x214   : > { %v1324_v53 = vpop.f32.mrf.mxu1  ;;  %v2556_v5 = vadd.f32 %v2555_v39, %v2554_v21  ;;  %v2567_v14 = vsel %vm414_vm1, %v2483_v57, 0.0  ;;  %v1848_v39 = vld [vmem:[#allocation2 + $0xf0] sm:$0xff] }
 0x215   : > { %2423 = vst.msk [vmem:[#allocation2 + $0xe0] sm:$0xff] %vm414_vm1, %v2358_v19  ;;  %v2325_v18 = vmul.f32 %v2244_v48, %v1813_v2  ;;  %v1618_v59 = vmul.f32 %v4056_v13, %v1550_v47  ;;  %v1715_v1 = vmul.f32 0.5, %v1651_v49  ;;  %v1325_v17 = vadd.f32 %v4043_v54, %v1324_v53  ;;  %v4278_v54 = vld [vmem:[%s4407_s6] ss:$0 sm:$0xff]  ;;  %v1488_v19 = vld [vmem:[%s3674_s15 + $0x1f0] sm:$0xff]  ;;  %v2485_v47 = vld [vmem:[#allocation2 + $0xb8] sm:$0xff] }
 0x216   : > { %v2558_v15 = vadd.f32 %v2557_v3, %v2556_v5  ;;  %v2569_v49 = vsel %vm414_vm1, %v2484_v63, 0.0  ;;  %v2254_v3 = vpop.permute.xlu1 %2253  ;;  %v1879_v5 = vld [vmem:[#allocation2 + $0x1e8] sm:$0xff] }
 0x217   : > { %v2389_v4 = vadd.f32 %v2325_v18, %v1877_v52  ;;  %v1682_v28 = vmul.f32 %v1618_v59, %v1618_v59  ;;  %v1783_v35 = vadd.f32 %v4064_v27, %v1715_v1  ;;  %v1520_v56 = vsub.f32 %v1456_v61, %v1325_v17  ;;  %v2486_v59 = vld [vmem:[#allocation2 + $0xc0] sm:$0xff] }
 0x218   : > { %v1417_v12 = vpop.f32.mrf.mxu3  ;;  %v2560_v38 = vadd.f32 %v2559_v8, %v2558_v15  ;;  %v2571_v1 = vsel %vm414_vm1, %v2485_v47, 0.0 }
 0x219   : > { %2454 = vst.msk [vmem:[#allocation2 + $0x1d8] sm:$0xff] %vm414_vm1, %v2389_v4  ;;  %v1746_v16 = vmul.f32 0.5, %v1682_v28  ;;  %v1418_v10 = vadd.f32 %v4278_v54, %v1417_v12  ;;  %v2295_v20 = vmul.f32 %v3890_v51, %v1783_v35  ;;  %v1588_v50 = vmul.f32 %v4056_v13, %v1520_v56  ;;  %v4289_v51 = vld [vmem:[%s4408_s7] ss:$0 sm:$0xff]  ;;  %v2487_v28 = vld [vmem:[#allocation2 + $0xc8] sm:$0xff] }
 0x21a   : > { %v2562_v6 = vadd.f32 %v2561_v11, %v2560_v38  ;;  %v1489_v11 = vld [vmem:[%s3674_s15 + $0x1f8] sm:$0xff] }
 0x21b   : > { %v1814_v41 = vadd.f32 %v4064_v27, %v1746_v16  ;;  %v1551_v9 = vsub.f32 %v1487_v0, %v1418_v10  ;;  %v2359_v26 = vadd.f32 %v2295_v20, %v1847_v55  ;;  %v1652_v29 = vmul.f32 %v1588_v50, %v1588_v50  ;;  %v1457_v27 = vld [vmem:[%s3674_s15 + $0xf8] sm:$0xff]  ;;  %v2488_v0 = vld [vmem:[#allocation2 + $0xd0] sm:$0xff]  ;;  %s383_s15 = sand.u32 1, %s3187_s10  }
 0x21c   : > { %v1327_v36 = vpop.f32.mrf.mxu1  ;;  %v2564_v44 = vadd.f32 %v2563_v33, %v2562_v6  ;;  %v2575_v55 = vsel %vm414_vm1, %v2487_v28, 0.0  ;;  %v2489_v50 = vld [vmem:[#allocation2 + $0xd8] sm:$0xff]  ;;  %v2259_v6 = vpop.permute.xlu2 %2258  ;;  %s2777_s20 = sshll.u32 %s383_s15, 3  ;;  %s2666_s0 = scalar_lea.sflag [#allocation4], %s383_s15 }
 0x21d   : > { %v2326_v37 = vmul.f32 %v2249_v22, %v1814_v41  ;;  %v1619_v13 = vmul.f32 %v4289_v51, %v1551_v9  ;;  %2424 = vst.msk [vmem:[#allocation2 + $0xe8] sm:$0xff] %vm414_vm1, %v2359_v26  ;;  %v1716_v43 = vmul.f32 0.5, %v1652_v29  ;;  %v1328_v45 = vadd.f32 %v4278_v54, %v1327_v36  ;;  %v1849_v38 = vld [vmem:[#allocation2 + $0xf8] sm:$0xff]  ;;  %v2490_v26 = vld [vmem:[#allocation2 + $0xe0] sm:$0xff]  ;;  %s385_s27 = scalar_lea.vmem [#allocation3], %s2777_s20  ;;  %s3145_s20 = scalar_lea.hbm %s4410_s9, 16 }
 0x21e   : > { %v2566_v2 = vadd.f32 %v2565_v34, %v2564_v44  ;;  %v2577_v9 = vsel %vm414_vm1, %v2488_v0, 0.0  ;;  %v2579_v57 = vsel %vm414_vm1, %v2489_v50, 0.0  ;;  %v2504_v50 = vld [vmem:[#allocation2 + $0x150] sm:$0xff]  ;;  %s2678_s28 = sshll.u32 %s385_s27, 4  ;;  %p3147_p2 = scmp.lt.s32.totalorder %s3145_s20, %s3141_s2  ;;  %s2679_s28 = int_to_ptr.vmem [resolvable:$true] %s2678_s28 }
 0x21f   : > { %v2390_v60 = vadd.f32 %v2326_v37, %v1878_v25  ;;  %v1683_v30 = vmul.f32 %v1619_v13, %v1619_v13  ;;  %v1784_v31 = vadd.f32 %v4300_v42, %v1716_v43  ;;  %v1521_v40 = vsub.f32 %v1457_v27, %v1328_v45  ;;  %v1880_v13 = vld [vmem:[#allocation2 + $0x1f0] sm:$0xff] }
 0x220   : > { %v1420_v62 = vpop.f32.mrf.mxu3  ;;  %v2568_v18 = vadd.f32 %v2567_v14, %v2566_v2  ;;  %v2494_v2 = vld [vmem:[#allocation2 + $0x100] sm:$0xff]  ;;  %p3148_p3 = por %p3147_p2, %p3146_p1 }
 0x221   : > { %2455 = vst.msk [vmem:[#allocation2 + $0x1e0] sm:$0xff] %vm414_vm1, %v2390_v60  ;;  %v1747_v48 = vmul.f32 0.5, %v1683_v30  ;;  %v1421_v52 = vadd.f32 %v4278_v54, %v1420_v62  ;;  %v2296_v21 = vmul.f32 %v3911_v32, %v1784_v31  ;;  %v1589_v58 = vmul.f32 %v4289_v51, %v1521_v40 }
 0x222   : > { %v2570_v4 = vadd.f32 %v2569_v49, %v2568_v18  ;;  %v2573_v32 = vsel %vm414_vm1, %v2486_v59, 0.0  ;;  %v2495_v49 = vld [vmem:[#allocation2 + $0x108] sm:$0xff]  ;;  %v2589_v18 = vsel %vm414_vm1, %v2494_v2, 0.0  ;;  %v2496_v59 = vld [vmem:[#allocation2 + $0x110] sm:$0xff]  ;;  %p3149_p5 = pnand %p3148_p3, %p3144_p0 }
 0x223   : > { %v1815_v53 = vadd.f32 %v4300_v42, %v1747_v48  ;;  %v1552_v61 = vsub.f32 %v1488_v19, %v1421_v52  ;;  %v2360_v17 = vadd.f32 %v2296_v21, %v1848_v39  ;;  %v1653_v7 = vmul.f32 %v1589_v58, %v1589_v58  ;;  %v1881_v19 = vld [vmem:[#allocation2 + $0x1f8] sm:$0xff] }
 0x224   : > { %v2572_v12 = vadd.f32 %v2571_v1, %v2570_v4  ;;  %v2491_v27 = vld [vmem:[#allocation2 + $0xe8] sm:$0xff]  ;;  %v2593_v1 = vsel %vm414_vm1, %v2496_v59, 0.0 }
 0x225   : > { %v2327_v8 = vmul.f32 %v2254_v3, %v1815_v53  ;;  %v1620_v35 = vmul.f32 %v4289_v51, %v1552_v61  ;;  %2425 = vst.msk [vmem:[#allocation2 + $0xf0] sm:$0xff] %vm414_vm1, %v2360_v17  ;;  %v1717_v56 = vmul.f32 0.5, %v1653_v7  ;;  %v2583_v60 = vsel %vm414_vm1, %v2491_v27, 0.0  ;;  %v2498_v17 = vld [vmem:[#allocation2 + $0x120] sm:$0xff]  ;;  %v2499_v4 = vld [vmem:[#allocation2 + $0x128] sm:$0xff]  ;;  %v2509_v27 = vld [vmem:[#allocation2 + $0x178] sm:$0xff] }
 0x226   : > { %v2574_v20 = vadd.f32 %v2573_v32, %v2572_v12  ;;  %v2591_v61 = vsel %vm414_vm1, %v2495_v49, 0.0  ;;  %v2501_v12 = vld [vmem:[#allocation2 + $0x138] sm:$0xff]  ;;  %v2516_v49 = vld [vmem:[#allocation2 + $0x1b0] sm:$0xff] }
 0x227   : > { %v2391_v15 = vadd.f32 %v2327_v8, %v1879_v5  ;;  %v1684_v23 = vmul.f32 %v1620_v35, %v1620_v35  ;;  %v1785_v16 = vadd.f32 %v4300_v42, %v1717_v56  ;;  %v2597_v8 = vsel %vm414_vm1, %v2498_v17, 0.0  ;;  %v2500_v35 = vld [vmem:[#allocation2 + $0x130] sm:$0xff] }
 0x228   : > { %v1423_v10 = vpop.f32.mrf.mxu3  ;;  %v2576_v33 = vadd.f32 %v2575_v55, %v2574_v20  ;;  %v2599_v56 = vsel %vm414_vm1, %v2499_v4, 0.0 }
 0x229   : > { %2456 = vst.msk [vmem:[#allocation2 + $0x1e8] sm:$0xff] %vm414_vm1, %v2391_v15  ;;  %v1748_v24 = vmul.f32 0.5, %v1684_v23  ;;  %v1424_v41 = vadd.f32 %v4278_v54, %v1423_v10  ;;  %v2297_v22 = vmul.f32 %v3931_v46, %v1785_v16  ;;  %v2581_v54 = vsel %vm414_vm1, %v2490_v26, 0.0  ;;  %v2502_v23 = vld [vmem:[#allocation2 + $0x140] sm:$0xff]  ;;  %v2503_v10 = vld [vmem:[#allocation2 + $0x148] sm:$0xff] }
 0x22a   : > { %v2578_v36 = vadd.f32 %v2577_v9, %v2576_v33  ;;  %v2601_v15 = vsel %vm414_vm1, %v2500_v35, 0.0  ;;  %v2603_v16 = vsel %vm414_vm1, %v2501_v12, 0.0  ;;  %v2605_v20 = vsel %vm414_vm1, %v2502_v23, 0.0  ;;  %v2506_v33 = vld [vmem:[#allocation2 + $0x160] sm:$0xff] }
 0x22b   : > { %v1816_v25 = vadd.f32 %v4300_v42, %v1748_v24  ;;  %v1553_v29 = vsub.f32 %v1489_v11, %v1424_v41  ;;  %v2361_v37 = vadd.f32 %v2297_v22, %v1849_v38  ;;  %v2607_v24 = vsel %vm414_vm1, %v2503_v10, 0.0  ;;  %v2505_v41 = vld [vmem:[#allocation2 + $0x158] sm:$0xff] }
 0x22c   : > { %v2580_v46 = vadd.f32 %v2579_v57, %v2578_v36  ;;  %v2492_v45 = vld [vmem:[#allocation2 + $0xf0] sm:$0xff]  ;;  %v2609_v22 = vsel %vm414_vm1, %v2504_v50, 0.0  ;;  %v2613_v57 = vsel %vm414_vm1, %v2506_v33, 0.0 }
 0x22d   : > { %v2328_v34 = vmul.f32 %v2259_v6, %v1816_v25  ;;  %v1621_v43 = vmul.f32 %v4289_v51, %v1553_v29  ;;  %2426 = vst.msk [vmem:[#allocation2 + $0xf8] sm:$0xff] %vm414_vm1, %v2361_v37  ;;  %v2585_v31 = vsel %vm414_vm1, %v2492_v45, 0.0  ;;  %v2264_v51 = vpop.permute.xlu0 %2263  ;;  %v2611_v25 = vsel %vm414_vm1, %v2505_v41, 0.0  ;;  %v2507_v29 = vld [vmem:[#allocation2 + $0x168] sm:$0xff]  ;;  %v2508_v37 = vld [vmem:[#allocation2 + $0x170] sm:$0xff] }
 0x22e   : > { %v2582_v30 = vadd.f32 %v2581_v54, %v2580_v46  ;;  %v2615_v36 = vsel %vm414_vm1, %v2507_v29, 0.0  ;;  %v2510_v54 = vld [vmem:[#allocation2 + $0x180] sm:$0xff]  ;;  %v2619_v45 = vsel %vm414_vm1, %v2509_v27, 0.0 }
 0x22f   : > { %v2392_v44 = vadd.f32 %v2328_v34, %v1880_v13  ;;  %v1685_v63 = vmul.f32 %v1621_v43, %v1621_v43  ;;  %v2617_v43 = vsel %vm414_vm1, %v2508_v37, 0.0 }
 0x230   : > { %v2584_v40 = vadd.f32 %v2583_v60, %v2582_v30  ;;  %v2621_v60 = vsel %vm414_vm1, %v2510_v54, 0.0  ;;  %v2512_v30 = vld [vmem:[#allocation2 + $0x190] sm:$0xff] }
 0x231   : > { %2457 = vst.msk [vmem:[#allocation2 + $0x1f0] sm:$0xff] %vm414_vm1, %v2392_v44  ;;  %v1749_v14 = vmul.f32 0.5, %v1685_v63  ;;  %v2511_v44 = vld [vmem:[#allocation2 + $0x188] sm:$0xff] }
 0x232   : > { %v2586_v47 = vadd.f32 %v2585_v31, %v2584_v40  ;;  %v2623_v31 = vsel %vm414_vm1, %v2511_v44, 0.0  ;;  %v2513_v40 = vld [vmem:[#allocation2 + $0x198] sm:$0xff] }
 0x233   : > { %v1817_v62 = vadd.f32 %v4300_v42, %v1749_v14  ;;  %v2497_v42 = vld [vmem:[#allocation2 + $0x118] sm:$0xff] }
 0x234   : > { %v2493_v39 = vld [vmem:[#allocation2 + $0xf8] sm:$0xff]  ;;  %v2595_v7 = vsel %vm414_vm1, %v2497_v42, 0.0 }
 0x235   : > { %v2329_v48 = vmul.f32 %v2264_v51, %v1817_v62  ;;  %v2587_v52 = vsel %vm414_vm1, %v2493_v39, 0.0  ;;  %v2625_v51 = vsel %vm414_vm1, %v2512_v30, 0.0  ;;  %v2515_v39 = vld [vmem:[#allocation2 + $0x1a8] sm:$0xff] }
 0x236   : > { %v2588_v21 = vadd.f32 %v2587_v52, %v2586_v47  ;;  %v2627_v47 = vsel %vm414_vm1, %v2513_v40, 0.0 }
 0x237   : > { %v2393_v58 = vadd.f32 %v2329_v48, %v1881_v19  ;;  %v2514_v19 = vld [vmem:[#allocation2 + $0x1a0] sm:$0xff] }
 0x238   : > { %v2590_v53 = vadd.f32 %v2589_v18, %v2588_v21  ;;  %v2629_v52 = vsel %vm414_vm1, %v2514_v19, 0.0  ;;  %v2517_v18 = vld [vmem:[#allocation2 + $0x1b8] sm:$0xff] }
 0x239   : > { %2458 = vst.msk [vmem:[#allocation2 + $0x1f8] sm:$0xff] %vm414_vm1, %v2393_v58  ;;  %v2631_v58 = vsel %vm414_vm1, %v2515_v39, 0.0 }
 0x23a   : > { %v2592_v3 = vadd.f32 %v2591_v61, %v2590_v53  ;;  %v2633_v53 = vsel %vm414_vm1, %v2516_v49, 0.0  ;;  %v2518_v61 = vld [vmem:[#allocation2 + $0x1c0] sm:$0xff] }
 0x23c   : > { %v2594_v5 = vadd.f32 %v2593_v1, %v2592_v3  ;;  %v2635_v3 = vsel %vm414_vm1, %v2517_v18, 0.0  ;;  %v2519_v1 = vld [vmem:[#allocation2 + $0x1c8] sm:$0xff] }
 0x23e   : > { %v2596_v28 = vadd.f32 %v2595_v7, %v2594_v5  ;;  %v2637_v5 = vsel %vm414_vm1, %v2518_v61, 0.0  ;;  %v2520_v7 = vld [vmem:[#allocation2 + $0x1d0] sm:$0xff] }
 0x240   : > { %v2598_v32 = vadd.f32 %v2597_v8, %v2596_v28  ;;  %v2639_v28 = vsel %vm414_vm1, %v2519_v1, 0.0  ;;  %v2521_v8 = vld [vmem:[#allocation2 + $0x1d8] sm:$0xff] }
 0x242   : > { %v2600_v0 = vadd.f32 %v2599_v56, %v2598_v32  ;;  %v2641_v32 = vsel %vm414_vm1, %v2520_v7, 0.0  ;;  %v2522_v56 = vld [vmem:[#allocation2 + $0x1e0] sm:$0xff] }
 0x244   : > { %v2602_v55 = vadd.f32 %v2601_v15, %v2600_v0  ;;  %v2643_v0 = vsel %vm414_vm1, %v2521_v8, 0.0  ;;  %v2523_v15 = vld [vmem:[#allocation2 + $0x1e8] sm:$0xff] }
 0x246   : > { %v2604_v11 = vadd.f32 %v2603_v16, %v2602_v55  ;;  %v2645_v55 = vsel %vm414_vm1, %v2522_v56, 0.0  ;;  %v2524_v16 = vld [vmem:[#allocation2 + $0x1f0] sm:$0xff] }
 0x248   : > { %v2606_v38 = vadd.f32 %v2605_v20, %v2604_v11  ;;  %v2647_v11 = vsel %vm414_vm1, %v2523_v15, 0.0  ;;  %v2525_v20 = vld [vmem:[#allocation2 + $0x1f8] sm:$0xff] }
 0x249   : > { %v2651_v41 = vsel %vm414_vm1, %v2525_v20, 0.0 }
 0x24a   : > { %v2608_v9 = vadd.f32 %v2607_v24, %v2606_v38  ;;  %v2649_v38 = vsel %vm414_vm1, %v2524_v16, 0.0 }
 0x24c   : > { %v2610_v26 = vadd.f32 %v2609_v22, %v2608_v9 }
 0x24e   : > { %v2612_v6 = vadd.f32 %v2611_v25, %v2610_v26 }
 0x250   : > { %v2614_v13 = vadd.f32 %v2613_v57, %v2612_v6 }
 0x252   : > { %v2616_v34 = vadd.f32 %v2615_v36, %v2614_v13 }
 0x254   : > { %v2618_v46 = vadd.f32 %v2617_v43, %v2616_v34 }
 0x256   : > { %v2620_v63 = vadd.f32 %v2619_v45, %v2618_v46 }
 0x258   : > { %v2622_v14 = vadd.f32 %v2621_v60, %v2620_v63 }
 0x25a   : > { %v2624_v62 = vadd.f32 %v2623_v31, %v2622_v14 }
 0x25c   : > { %v2626_v2 = vadd.f32 %v2625_v51, %v2624_v62 }
 0x25e   : > { %v2628_v48 = vadd.f32 %v2627_v47, %v2626_v2 }
 0x260   : > { %v2630_v21 = vadd.f32 %v2629_v52, %v2628_v48 }
 0x262   : > { %v2632_v59 = vadd.f32 %v2631_v58, %v2630_v21 }
 0x264   : > { %v2634_v42 = vadd.f32 %v2633_v53, %v2632_v59 }
 0x266   : > { %v2636_v17 = vadd.f32 %v2635_v3, %v2634_v42 }
 0x268   : > { %v2638_v4 = vadd.f32 %v2637_v5, %v2636_v17 }
 0x26a   : > { %v2640_v35 = vadd.f32 %v2639_v28, %v2638_v4 }
 0x26c   : > { %v2642_v12 = vadd.f32 %v2641_v32, %v2640_v35 }
 0x26e   : > { %v2644_v23 = vadd.f32 %v2643_v0, %v2642_v12 }
 0x270   : > { %v2646_v10 = vadd.f32 %v2645_v55, %v2644_v23 }
 0x272   : > { %v2648_v50 = vadd.f32 %v2647_v11, %v2646_v10 }
 0x274   : > { %v2650_v24 = vadd.f32 %v2649_v38, %v2648_v50 }
 0x276   : > { %v2652_v9 = vadd.f32 %v2651_v41, %v2650_v24 }
 0x278   : > { %2653 = vadd.xlane.f32.xlu1 %v2652_v9 }
 0x2eb   : > { %v2654_v22 = vpop.xlane.xlu1 %2653 }
 0x2ec   : > { %v2655_v33 = vrot.slane %v2654_v22, 4 }
 0x2ee   : > { %v2656_v26 = vadd.f32 %v2655_v33, %v2654_v22 }
 0x2f0   : > { %v2657_v25 = vrot.slane %v2656_v26, 2 }
 0x2f2   : > { %v2658_v29 = vadd.f32 %v2657_v25, %v2656_v26 }
 0x2f4   : > { %v2659_v6 = vrot.slane %v2658_v29, 1 }
 0x2f6   : > { %v2660_v57 = vadd.f32 %v2659_v6, %v2658_v29 }
 0x2f8   : > { %2924 = vpush %v2660_v57 }
 0x329   : > { %s2925_s16 = spop %2924 }
 0x32a   : > { %s2662_s29 = smul.f32 0.5, %s2925_s16 }
 0x32c   : > { %v2663_v37 = vstv %s2662_s29 }
 0x32d   : > { %2664 = vst [vmem:[%s385_s27] sm:$0xff] %v2663_v37 }
 0x32e   : > { %3152 = shalt.err (!%p3149_p5)
}
 0x32f   : > { %2926 = dma.vmem_to_hbm [thread:$0]  (%p3297_p4), %s2679_s28, 128, %s2681_s24, %s2666_s0  }
 0x330 PF: > { %p2932_p6 = scmp.ge.s32.totalorder %s3203_s14, 2  ;;  %s2692_s15 = sand.u32 1, %s3183_s30  }
 0x331   : > { %s2693_s26 = scalar_lea.sflag [#allocation4], %s2692_s15 }
 0x332   : > { %p2929_p7 = pnand %p2932_p6, %p3304_p8 }
 0x334   : > { %p2930_p9 = pneg %p2929_p7 }
 0x336   : > { %3178 = dma.done.wait (%p2930_p9), %s2693_s26, 128  }
 0x337   : > { %3180 = vsyncadd (%p2930_p9), %s2693_s26, 4294967168  ;;  %s22_s14 = sadd.s32 1, %s3203_s14   ;;  %s4419_s30 = smov %s3187_s10 }
 0x338   : > { %p19_p10 = scmp.ge.s32.totalorder %s22_s14, 4   ;;  %s4420_s10 = smov %s3191_s11 }
 0x339   : > { %s4421_s11 = smov %s3310_s22  ;;  %s4422_s12 = smov %s3199_s13 }
 0x33a   : > { %s4423_s13 = smov %s4425_s17  ;;  %21 = sbr.rel (!%p19_p10) target bundleno = 8 (0x8), region = 105 }
 0x33f   :  { %2699 = vsyncpa [#allocation4], 1 }
 0x340   :  { %2701 = vsyncpa [#allocation4 + $0x1], 1 }

</bundles_post_ra>
